<compile_context>
chip_gen: v5e
topology: v5e:2x2
jax: 0.10.0
libtpu: 0.0.40
codegen_flags: <defaults>
</compile_context>

<pallas_src>
import functools

import numpy as np
import jax
import jax.numpy as jnp
from jax import lax
from jax.experimental import pallas as pl
from jax.experimental.pallas import tpu as pltpu


def _tree_lstm_backward_kernel(
    parent_pos_ref,                                      # SMEM scalar prefetch [n_pad]
    feat_ref, wx_ref, bxh_ref, wh_ref, wp_ref, bp_ref,   # VMEM inputs
    out_ref,                                             # VMEM output [n_pad, H] (level order)
    xg_ref, px_ref, c_state, h_state, lvl_h, lvl_c,      # VMEM scratch
    *, num_levels,
):
    H = wp_ref.shape[1]
    LEVEL_W = lvl_h.shape[0]

    # Zero-init the state arrays so the dedicated zero row (row n_pad, the "parent" of
    # forest roots and of padding slots) is really zero and no stale VMEM is ever read.
    c_state[...] = jnp.zeros_like(c_state)
    h_state[...] = jnp.zeros_like(h_state)

    # --- Batched input projections for every node at once (MXU hot path) ---
    #   xg = feat @ Wx + (bx + bh)   -> [n_pad, 5H]   (both constant biases folded)
    #   px = feat @ Wp + bp          -> [n_pad, H]
    xg_ref[...] = (
        jnp.dot(feat_ref[...], wx_ref[...], preferred_element_type=jnp.float32)
        + bxh_ref[...]
    )
    px_ref[...] = (
        jnp.dot(feat_ref[...], wp_ref[...], preferred_element_type=jnp.float32)
        + bp_ref[...]
    )

    unroll_gather = LEVEL_W <= 32

    # --- Sequential root-to-leaves recurrence, one step per tree level ---
    def level_step(l, carry):
        base = pl.multiple_of(l * LEVEL_W, LEVEL_W)

        # Gather the parent (h, c) rows of every node in this level into contiguous
        # buffers.  Parents live in previous levels or the zero row, so reads are valid.
        def gather(j, c):
            p = parent_pos_ref[base + j]
            lvl_h[pl.ds(j, 1), :] = h_state[pl.ds(p, 1), :]
            lvl_c[pl.ds(j, 1), :] = c_state[pl.ds(p, 1), :]
            return c

        lax.fori_loop(0, LEVEL_W, gather, 0, unroll=unroll_gather)

        # One [LEVEL_W, H] @ [H, 5H] matmul per level: the recurrence weight is pushed
        # once per level and amortized over every node of the level.
        iofu = xg_ref[pl.ds(base, LEVEL_W), :] + jnp.dot(
            lvl_h[...], wh_ref[...], preferred_element_type=jnp.float32
        )
        i = jax.nn.sigmoid(iofu[:, 0 * H:1 * H])
        o = jax.nn.sigmoid(iofu[:, 1 * H:2 * H])
        f = jax.nn.sigmoid(iofu[:, 2 * H:3 * H])
        u = jnp.tanh(iofu[:, 3 * H:4 * H])
        r = jax.nn.sigmoid(iofu[:, 4 * H:5 * H])

        c = i * u + f * lvl_c[...]
        h = o * jnp.tanh(c)
        h_final = r * h + (1.0 - r) * px_ref[pl.ds(base, LEVEL_W), :]

        c_state[pl.ds(base, LEVEL_W), :] = c
        h_state[pl.ds(base, LEVEL_W), :] = h_final
        out_ref[pl.ds(base, LEVEL_W), :] = h_final   # level/storage order
        return carry

    lax.fori_loop(0, num_levels, level_step, 0)


def one_directional_tree_lstm_backward(features, params, children, roots):
    N, F = features.shape
    H = params["wp"].shape[1]
    assert H % 128 == 0, "h_dim must be a multiple of 128 for lane-aligned gate slices"

    num_levels, level_w, slot_obj, parent_pos, obj_pos = linearize_forest_by_level(
        children, roots, N
    )
    n_pad = num_levels * level_w

    # Permute features into level/storage order host-side (padding slots read row 0;
    # their outputs are discarded and their state rows are never used as parents).
    feat_storage = jnp.take(features, jnp.asarray(slot_obj), axis=0)   # [n_pad, F]
    bxh = params["bx"] + params["bh"]                                  # fold both biases

    kernel = functools.partial(_tree_lstm_backward_kernel, num_levels=num_levels)

    # Explicit VMEM budget (inputs double-buffered + scratch) with headroom.
    approx_vmem = 4 * (
        2 * (n_pad * (F + H) + F * 5 * H + 5 * H + H * 5 * H + F * H + H)
        + n_pad * 6 * H + 2 * (n_pad + 8) * H + 2 * level_w * H
    ) + (2 << 20)
    vmem_limit = int(min(max(approx_vmem, 16 << 20), 48 << 20))

    grid_spec = pltpu.PrefetchScalarGridSpec(
        num_scalar_prefetch=1,
        grid=(1,),
        in_specs=[
            pl.BlockSpec((n_pad, F), lambda i, pp: (0, 0)),       # features (level order)
            pl.BlockSpec((F, 5 * H), lambda i, pp: (0, 0)),       # W_iofux^T
            pl.BlockSpec((1, 5 * H), lambda i, pp: (0, 0)),       # b_iofux + b_iofuh
            pl.BlockSpec((H, 5 * H), lambda i, pp: (0, 0)),       # W_iofuh^T
            pl.BlockSpec((F, H), lambda i, pp: (0, 0)),           # W_px^T
            pl.BlockSpec((1, H), lambda i, pp: (0, 0)),           # b_px
        ],
        out_specs=pl.BlockSpec((n_pad, H), lambda i, pp: (0, 0)),
        scratch_shapes=[
            pltpu.VMEM((n_pad, 5 * H), jnp.float32),    # xg = feat@Wx + bx + bh
            pltpu.VMEM((n_pad, H), jnp.float32),        # px = feat@Wp + bp
            pltpu.VMEM((n_pad + 8, H), jnp.float32),    # c_state (last 8 rows = zero rows)
            pltpu.VMEM((n_pad + 8, H), jnp.float32),    # h_state (last 8 rows = zero rows)
            pltpu.VMEM((level_w, H), jnp.float32),      # gathered parent h for one level
            pltpu.VMEM((level_w, H), jnp.float32),      # gathered parent c for one level
        ],
    )
    out_storage = pl.pallas_call(
        kernel,
        out_shape=jax.ShapeDtypeStruct((n_pad, H), jnp.float32),
        grid_spec=grid_spec,
        compiler_params=pltpu.CompilerParams(
            dimension_semantics=("arbitrary",),
            vmem_limit_bytes=vmem_limit,
        ),
    )(
        jnp.asarray(parent_pos),
        feat_storage,
        params["wx"], bxh, params["wh"], params["wp"], params["bp"],
    )

    # Recover original object order with a static permutation OUTSIDE the serial kernel.
    return jnp.take(out_storage, jnp.asarray(obj_pos), axis=0)


# ----------------------------- host-side glue -----------------------------

def linearize_forest_by_level(children, roots, num_obj, pad_to=8):
    """BFS level (wavefront) scheduling of the forest.

    Returns:
      num_levels, level_w (padded level width, multiple of 8),
      slot_obj[n_pad]   : object index feeding each storage slot (0 for padding),
      parent_pos[n_pad] : storage slot of the parent, or n_pad (the zero row) for
                          roots / padding slots,
      obj_pos[num_obj]  : storage slot holding each object's output.
    """
    levels = []
    frontier = [int(r) for r in roots]
    parent_of = {int(r): -1 for r in roots}
    seen = set(int(r) for r in roots)
    while frontier:
        levels.append(list(frontier))
        nxt = []
        for node in frontier:
            for ch in children.get(node, []):
                ch = int(ch)
                assert ch not in seen, "forest is not a valid tree set"
                seen.add(ch)
                parent_of[ch] = int(node)
                nxt.append(ch)
        frontier = nxt
    assert len(seen) == num_obj, "forest must cover all objects"

    num_levels = len(levels)
    max_w = max(len(lv) for lv in levels)
    level_w = max(pad_to, ((max_w + pad_to - 1) // pad_to) * pad_to)
    n_pad = num_levels * level_w
    zero_row = n_pad                           # dedicated all-zero state row

    slot_obj = np.zeros((n_pad,), np.int32)
    parent_pos = np.full((n_pad,), zero_row, np.int32)
    obj_pos = np.zeros((num_obj,), np.int32)
    pos_of = {}
    for l, nodes in enumerate(levels):
        for j, node in enumerate(nodes):
            pos = l * level_w + j
            pos_of[node] = pos
            slot_obj[pos] = node
            obj_pos[node] = pos
            p = parent_of[node]
            if p >= 0:
                parent_pos[pos] = pos_of[p]    # parent is always in an earlier level
    return num_levels, level_w, slot_obj, parent_pos, obj_pos


def linearize_forest_preorder(children, roots):
    """Pre-order traversal identical to the HrTreeLSTM_Backward.forward recursion
    (used only by the numpy reference)."""
    proc_idx, parent_step = [], []

    def visit(node, pstep):
        step = len(proc_idx)
        proc_idx.append(node)
        parent_step.append(pstep)
        for ch in children.get(node, []):
            visit(ch, step)

    for r in roots:
        visit(r, -1)
    return np.asarray(proc_idx, np.int32), np.asarray(parent_step, np.int32)


def make_params(key, feat_dim, h_dim):
    """Deterministic stand-in for block_orthogonal init (same shapes / bias semantics)."""
    k1, k2, k3 = jax.random.split(key, 3)
    # PyTorch nn.Linear weights are [out, in]; store transposed [in, out] for the kernel.
    wx = (jax.random.normal(k1, (5 * h_dim, feat_dim), jnp.float32) * 0.05).T
    wh = (jax.random.normal(k2, (5 * h_dim, h_dim), jnp.float32) * 0.05).T
    wp = (jax.random.normal(k3, (h_dim, feat_dim), jnp.float32) * 0.05).T
    bx = jnp.zeros((1, 5 * h_dim), jnp.float32)
    bh = jnp.zeros((1, 5 * h_dim), jnp.float32)
    bh = bh.at[0, 2 * h_dim:3 * h_dim].set(1.0)   # forget-gate bias = 1 (as in __init__)
    bp = jnp.zeros((1, h_dim), jnp.float32)
    return {"wx": wx, "bx": bx, "wh": wh, "bh": bh, "wp": wp, "bp": bp}


def reference_forward(features, params, proc_idx, parent_step):
    """Pure numpy replica of the PyTorch recursion (eval mode, dropout=0)."""
    feat = np.asarray(features, np.float64)
    wx, bx = np.asarray(params["wx"], np.float64), np.asarray(params["bx"], np.float64)
    wh, bh = np.asarray(params["wh"], np.float64), np.asarray(params["bh"], np.float64)
    wp, bp = np.asarray(params["wp"], np.float64), np.asarray(params["bp"], np.float64)
    N = feat.shape[0]
    H = wp.shape[1]
    sig = lambda x: 1.0 / (1.0 + np.exp(-x))
    c_state = np.zeros((N, H))
    h_state = np.zeros((N, H))
    out = np.zeros((N, H))
    for t in range(N):
        idx, p = int(proc_idx[t]), int(parent_step[t])
        root_h = h_state[p] if p >= 0 else np.zeros(H)
        root_c = c_state[p] if p >= 0 else np.zeros(H)
        iofu = feat[idx] @ wx + bx[0] + root_h @ wh + bh[0]
        i, o, f, u, r = (sig(iofu[0:H]), sig(iofu[H:2 * H]), sig(iofu[2 * H:3 * H]),
                         np.tanh(iofu[3 * H:4 * H]), sig(iofu[4 * H:5 * H]))
        proj_x = feat[idx] @ wp + bp[0]
        c = i * u + f * root_c
        h = o * np.tanh(c)
        h_final = r * h + (1.0 - r) * proj_x
        c_state[t], h_state[t], out[idx] = c, h_final, h_final
    return out


if __name__ == "__main__":
    NUM_OBJ, FEAT_DIM, H_DIM = 16, 256, 128

    key = jax.random.PRNGKey(0)
    kf, kp = jax.random.split(key)
    features = jax.random.normal(kf, (NUM_OBJ, FEAT_DIM), jnp.float32)
    params = make_params(kp, FEAT_DIM, H_DIM)

    # Synthetic forest of 2 trees covering all 16 objects.
    children = {
        0: [1, 2, 3], 1: [4, 5], 2: [6], 3: [7],
        8: [9, 10], 9: [11, 12, 13], 10: [14, 15],
    }
    roots = [0, 8]

    out = one_directional_tree_lstm_backward(features, params, children, roots)
    out = jax.block_until_ready(out)

    proc_idx, parent_step = linearize_forest_preorder(children, roots)
    ref = reference_forward(np.asarray(features), params, proc_idx, parent_step)
    max_err = float(np.max(np.abs(np.asarray(out, np.float64) - ref)))
    assert out.shape == (NUM_OBJ, H_DIM)
    assert max_err < 1e-2, f"mismatch vs reference: {max_err}"
    print("KERNEL_OK")
</pallas_src>

<mosaic_0001>
module attributes {stable_mosaic.version = 11 : i64} {
  func.func @_tree_lstm_backward_kernel(%arg0: i32, %arg1: memref<48xi32, #tpu.memory_space<smem>>, %arg2: memref<48x256xf32, #tpu.memory_space<vmem>>, %arg3: memref<256x640xf32, #tpu.memory_space<vmem>>, %arg4: memref<1x640xf32, #tpu.memory_space<vmem>>, %arg5: memref<128x640xf32, #tpu.memory_space<vmem>>, %arg6: memref<256x128xf32, #tpu.memory_space<vmem>>, %arg7: memref<1x128xf32, #tpu.memory_space<vmem>>, %arg8: memref<48x128xf32, #tpu.memory_space<vmem>>, %arg9: memref<48x640xf32, #tpu.memory_space<vmem>>, %arg10: memref<48x128xf32, #tpu.memory_space<vmem>>, %arg11: memref<56x128xf32, #tpu.memory_space<vmem>>, %arg12: memref<56x128xf32, #tpu.memory_space<vmem>>, %arg13: memref<16x128xf32, #tpu.memory_space<vmem>>, %arg14: memref<16x128xf32, #tpu.memory_space<vmem>>) attributes {dimension_semantics = [#tpu.dimension_semantics<arbitrary>], iteration_bounds = array<i64: 1>, scalar_prefetch = 1 : i64, scratch_operands = 6 : i64, tpu.core_type = #tpu.core_type<tc>, window_params = [{pipeline_mode = #tpu.pipeline_mode<synchronous>, transform_indices = @transform_0, window_bounds = array<i64: 48, 256>}, {pipeline_mode = #tpu.pipeline_mode<synchronous>, transform_indices = @transform_1, window_bounds = array<i64: 256, 640>}, {pipeline_mode = #tpu.pipeline_mode<synchronous>, transform_indices = @transform_2, window_bounds = array<i64: 1, 640>}, {pipeline_mode = #tpu.pipeline_mode<synchronous>, transform_indices = @transform_3, window_bounds = array<i64: 128, 640>}, {pipeline_mode = #tpu.pipeline_mode<synchronous>, transform_indices = @transform_4, window_bounds = array<i64: 256, 128>}, {pipeline_mode = #tpu.pipeline_mode<synchronous>, transform_indices = @transform_5, window_bounds = array<i64: 1, 128>}, {pipeline_mode = #tpu.pipeline_mode<synchronous>, transform_indices = @transform_6, window_bounds = array<i64: 48, 128>}]} {
    %cst = arith.constant 0.000000e+00 : f32
    %0 = vector.broadcast %cst : f32 to vector<56x128xf32>
    %c0 = arith.constant 0 : index
    %c0_0 = arith.constant 0 : index
    %1 = vector.load %arg11[%c0, %c0_0] : memref<56x128xf32, #tpu.memory_space<vmem>>, vector<56x128xf32>
    tpu.vector_store %arg11[%c0, %c0_0], %0 {strides = array<i32>} : memref<56x128xf32, #tpu.memory_space<vmem>>, vector<56x128xf32>,
    %cst_1 = arith.constant 0.000000e+00 : f32
    %2 = vector.broadcast %cst_1 : f32 to vector<56x128xf32>
    %c0_2 = arith.constant 0 : index
    %c0_3 = arith.constant 0 : index
    %3 = vector.load %arg12[%c0_2, %c0_3] : memref<56x128xf32, #tpu.memory_space<vmem>>, vector<56x128xf32>
    tpu.vector_store %arg12[%c0_2, %c0_3], %2 {strides = array<i32>} : memref<56x128xf32, #tpu.memory_space<vmem>>, vector<56x128xf32>,
    %c0_4 = arith.constant 0 : index
    %c0_5 = arith.constant 0 : index
    %4 = vector.load %arg2[%c0_4, %c0_5] : memref<48x256xf32, #tpu.memory_space<vmem>>, vector<48x256xf32>
    %c0_6 = arith.constant 0 : index
    %c0_7 = arith.constant 0 : index
    %5 = vector.load %arg3[%c0_6, %c0_7] : memref<256x640xf32, #tpu.memory_space<vmem>>, vector<256x640xf32>
    %cst_8 = arith.constant dense<0.000000e+00> : vector<48x640xf32>
    %6 = tpu.matmul %4, %5, %cst_8 {dimension_numbers = #tpu.dot_dimension_numbers<[1], [0], [0], [1], [0, 0, 1, 1], [], []>} : vector<48x256xf32>, vector<256x640xf32>, vector<48x640xf32> -> vector<48x640xf32>
    %c0_9 = arith.constant 0 : index
    %c0_10 = arith.constant 0 : index
    %7 = vector.load %arg4[%c0_9, %c0_10] : memref<1x640xf32, #tpu.memory_space<vmem>>, vector<1x640xf32>
    %8 = vector.broadcast %7 : vector<1x640xf32> to vector<48x640xf32>
    %9 = arith.addf %6, %8 : vector<48x640xf32>
    %c0_11 = arith.constant 0 : index
    %c0_12 = arith.constant 0 : index
    %10 = vector.load %arg9[%c0_11, %c0_12] : memref<48x640xf32, #tpu.memory_space<vmem>>, vector<48x640xf32>
    tpu.vector_store %arg9[%c0_11, %c0_12], %9 {strides = array<i32>} : memref<48x640xf32, #tpu.memory_space<vmem>>, vector<48x640xf32>,
    %c0_13 = arith.constant 0 : index
    %c0_14 = arith.constant 0 : index
    %11 = vector.load %arg2[%c0_13, %c0_14] : memref<48x256xf32, #tpu.memory_space<vmem>>, vector<48x256xf32>
    %c0_15 = arith.constant 0 : index
    %c0_16 = arith.constant 0 : index
    %12 = vector.load %arg6[%c0_15, %c0_16] : memref<256x128xf32, #tpu.memory_space<vmem>>, vector<256x128xf32>
    %cst_17 = arith.constant dense<0.000000e+00> : vector<48x128xf32>
    %13 = tpu.matmul %11, %12, %cst_17 {dimension_numbers = #tpu.dot_dimension_numbers<[1], [0], [0], [1], [0, 0, 1, 1], [], []>} : vector<48x256xf32>, vector<256x128xf32>, vector<48x128xf32> -> vector<48x128xf32>
    %c0_18 = arith.constant 0 : index
    %c0_19 = arith.constant 0 : index
    %14 = vector.load %arg7[%c0_18, %c0_19] : memref<1x128xf32, #tpu.memory_space<vmem>>, vector<1x128xf32>
    %15 = vector.broadcast %14 : vector<1x128xf32> to vector<48x128xf32>
    %16 = arith.addf %13, %15 : vector<48x128xf32>
    %c0_20 = arith.constant 0 : index
    %c0_21 = arith.constant 0 : index
    %17 = vector.load %arg10[%c0_20, %c0_21] : memref<48x128xf32, #tpu.memory_space<vmem>>, vector<48x128xf32>
    tpu.vector_store %arg10[%c0_20, %c0_21], %16 {strides = array<i32>} : memref<48x128xf32, #tpu.memory_space<vmem>>, vector<48x128xf32>,
    %c0_i32 = arith.constant 0 : i32
    %c3_i32 = arith.constant 3 : i32
    %18 = arith.addi %c0_i32, %c3_i32 : i32
    %c1_i32 = arith.constant 1 : i32
    scf.for %arg15 = %c0_i32 to %18 step %c1_i32  : i32 {
      %c16_i32 = arith.constant 16 : i32
      %19 = arith.muli %arg15, %c16_i32 : i32
      %20 = tpu.assume_multiple %19, 16 : i32
      %c0_i32_23 = arith.constant 0 : i32
      %21 = arith.addi %20, %c0_i32_23 : i32
      %22 = arith.index_cast %21 : i32 to index
      %23 = memref.load %arg1[%22] : memref<48xi32, #tpu.memory_space<smem>>
      %24 = arith.index_cast %23 : i32 to index
      %c0_24 = arith.constant 0 : index
      %25 = vector.load %arg12[%24, %c0_24] : memref<56x128xf32, #tpu.memory_space<vmem>>, vector<1x128xf32>
      %26 = arith.index_cast %c0_i32_23 : i32 to index
      %c0_25 = arith.constant 0 : index
      %27 = vector.load %arg13[%26, %c0_25] : memref<16x128xf32, #tpu.memory_space<vmem>>, vector<1x128xf32>
      tpu.vector_store %arg13[%26, %c0_25], %25 {strides = array<i32>} : memref<16x128xf32, #tpu.memory_space<vmem>>, vector<1x128xf32>,
      %28 = arith.index_cast %23 : i32 to index
      %c0_26 = arith.constant 0 : index
      %29 = vector.load %arg11[%28, %c0_26] : memref<56x128xf32, #tpu.memory_space<vmem>>, vector<1x128xf32>
      %30 = arith.index_cast %c0_i32_23 : i32 to index
      %c0_27 = arith.constant 0 : index
      %31 = vector.load %arg14[%30, %c0_27] : memref<16x128xf32, #tpu.memory_space<vmem>>, vector<1x128xf32>
      tpu.vector_store %arg14[%30, %c0_27], %29 {strides = array<i32>} : memref<16x128xf32, #tpu.memory_space<vmem>>, vector<1x128xf32>,
      %c1_i32_28 = arith.constant 1 : i32
      %32 = arith.addi %20, %c1_i32_28 : i32
      %33 = arith.index_cast %32 : i32 to index
      %34 = memref.load %arg1[%33] : memref<48xi32, #tpu.memory_space<smem>>
      %35 = arith.index_cast %34 : i32 to index
      %c0_29 = arith.constant 0 : index
      %36 = vector.load %arg12[%35, %c0_29] : memref<56x128xf32, #tpu.memory_space<vmem>>, vector<1x128xf32>
      %37 = arith.index_cast %c1_i32_28 : i32 to index
      %c0_30 = arith.constant 0 : index
      %38 = vector.load %arg13[%37, %c0_30] : memref<16x128xf32, #tpu.memory_space<vmem>>, vector<1x128xf32>
      tpu.vector_store %arg13[%37, %c0_30], %36 {strides = array<i32>} : memref<16x128xf32, #tpu.memory_space<vmem>>, vector<1x128xf32>,
      %39 = arith.index_cast %34 : i32 to index
      %c0_31 = arith.constant 0 : index
      %40 = vector.load %arg11[%39, %c0_31] : memref<56x128xf32, #tpu.memory_space<vmem>>, vector<1x128xf32>
      %41 = arith.index_cast %c1_i32_28 : i32 to index
      %c0_32 = arith.constant 0 : index
      %42 = vector.load %arg14[%41, %c0_32] : memref<16x128xf32, #tpu.memory_space<vmem>>, vector<1x128xf32>
      tpu.vector_store %arg14[%41, %c0_32], %40 {strides = array<i32>} : memref<16x128xf32, #tpu.memory_space<vmem>>, vector<1x128xf32>,
      %c2_i32 = arith.constant 2 : i32
      %43 = arith.addi %20, %c2_i32 : i32
      %44 = arith.index_cast %43 : i32 to index
      %45 = memref.load %arg1[%44] : memref<48xi32, #tpu.memory_space<smem>>
      %46 = arith.index_cast %45 : i32 to index
      %c0_33 = arith.constant 0 : index
      %47 = vector.load %arg12[%46, %c0_33] : memref<56x128xf32, #tpu.memory_space<vmem>>, vector<1x128xf32>
      %48 = arith.index_cast %c2_i32 : i32 to index
      %c0_34 = arith.constant 0 : index
      %49 = vector.load %arg13[%48, %c0_34] : memref<16x128xf32, #tpu.memory_space<vmem>>, vector<1x128xf32>
      tpu.vector_store %arg13[%48, %c0_34], %47 {strides = array<i32>} : memref<16x128xf32, #tpu.memory_space<vmem>>, vector<1x128xf32>,
      %50 = arith.index_cast %45 : i32 to index
      %c0_35 = arith.constant 0 : index
      %51 = vector.load %arg11[%50, %c0_35] : memref<56x128xf32, #tpu.memory_space<vmem>>, vector<1x128xf32>
      %52 = arith.index_cast %c2_i32 : i32 to index
      %c0_36 = arith.constant 0 : index
      %53 = vector.load %arg14[%52, %c0_36] : memref<16x128xf32, #tpu.memory_space<vmem>>, vector<1x128xf32>
      tpu.vector_store %arg14[%52, %c0_36], %51 {strides = array<i32>} : memref<16x128xf32, #tpu.memory_space<vmem>>, vector<1x128xf32>,
      %c3_i32_37 = arith.constant 3 : i32
      %54 = arith.addi %20, %c3_i32_37 : i32
      %55 = arith.index_cast %54 : i32 to index
      %56 = memref.load %arg1[%55] : memref<48xi32, #tpu.memory_space<smem>>
      %57 = arith.index_cast %56 : i32 to index
      %c0_38 = arith.constant 0 : index
      %58 = vector.load %arg12[%57, %c0_38] : memref<56x128xf32, #tpu.memory_space<vmem>>, vector<1x128xf32>
      %59 = arith.index_cast %c3_i32_37 : i32 to index
      %c0_39 = arith.constant 0 : index
      %60 = vector.load %arg13[%59, %c0_39] : memref<16x128xf32, #tpu.memory_space<vmem>>, vector<1x128xf32>
      tpu.vector_store %arg13[%59, %c0_39], %58 {strides = array<i32>} : memref<16x128xf32, #tpu.memory_space<vmem>>, vector<1x128xf32>,
      %61 = arith.index_cast %56 : i32 to index
      %c0_40 = arith.constant 0 : index
      %62 = vector.load %arg11[%61, %c0_40] : memref<56x128xf32, #tpu.memory_space<vmem>>, vector<1x128xf32>
      %63 = arith.index_cast %c3_i32_37 : i32 to index
      %c0_41 = arith.constant 0 : index
      %64 = vector.load %arg14[%63, %c0_41] : memref<16x128xf32, #tpu.memory_space<vmem>>, vector<1x128xf32>
      tpu.vector_store %arg14[%63, %c0_41], %62 {strides = array<i32>} : memref<16x128xf32, #tpu.memory_space<vmem>>, vector<1x128xf32>,
      %c4_i32 = arith.constant 4 : i32
      %65 = arith.addi %20, %c4_i32 : i32
      %66 = arith.index_cast %65 : i32 to index
      %67 = memref.load %arg1[%66] : memref<48xi32, #tpu.memory_space<smem>>
      %68 = arith.index_cast %67 : i32 to index
      %c0_42 = arith.constant 0 : index
      %69 = vector.load %arg12[%68, %c0_42] : memref<56x128xf32, #tpu.memory_space<vmem>>, vector<1x128xf32>
      %70 = arith.index_cast %c4_i32 : i32 to index
      %c0_43 = arith.constant 0 : index
      %71 = vector.load %arg13[%70, %c0_43] : memref<16x128xf32, #tpu.memory_space<vmem>>, vector<1x128xf32>
      tpu.vector_store %arg13[%70, %c0_43], %69 {strides = array<i32>} : memref<16x128xf32, #tpu.memory_space<vmem>>, vector<1x128xf32>,
      %72 = arith.index_cast %67 : i32 to index
      %c0_44 = arith.constant 0 : index
      %73 = vector.load %arg11[%72, %c0_44] : memref<56x128xf32, #tpu.memory_space<vmem>>, vector<1x128xf32>
      %74 = arith.index_cast %c4_i32 : i32 to index
      %c0_45 = arith.constant 0 : index
      %75 = vector.load %arg14[%74, %c0_45] : memref<16x128xf32, #tpu.memory_space<vmem>>, vector<1x128xf32>
      tpu.vector_store %arg14[%74, %c0_45], %73 {strides = array<i32>} : memref<16x128xf32, #tpu.memory_space<vmem>>, vector<1x128xf32>,
      %c5_i32 = arith.constant 5 : i32
      %76 = arith.addi %20, %c5_i32 : i32
      %77 = arith.index_cast %76 : i32 to index
      %78 = memref.load %arg1[%77] : memref<48xi32, #tpu.memory_space<smem>>
      %79 = arith.index_cast %78 : i32 to index
      %c0_46 = arith.constant 0 : index
      %80 = vector.load %arg12[%79, %c0_46] : memref<56x128xf32, #tpu.memory_space<vmem>>, vector<1x128xf32>
      %81 = arith.index_cast %c5_i32 : i32 to index
      %c0_47 = arith.constant 0 : index
      %82 = vector.load %arg13[%81, %c0_47] : memref<16x128xf32, #tpu.memory_space<vmem>>, vector<1x128xf32>
      tpu.vector_store %arg13[%81, %c0_47], %80 {strides = array<i32>} : memref<16x128xf32, #tpu.memory_space<vmem>>, vector<1x128xf32>,
      %83 = arith.index_cast %78 : i32 to index
      %c0_48 = arith.constant 0 : index
      %84 = vector.load %arg11[%83, %c0_48] : memref<56x128xf32, #tpu.memory_space<vmem>>, vector<1x128xf32>
      %85 = arith.index_cast %c5_i32 : i32 to index
      %c0_49 = arith.constant 0 : index
      %86 = vector.load %arg14[%85, %c0_49] : memref<16x128xf32, #tpu.memory_space<vmem>>, vector<1x128xf32>
      tpu.vector_store %arg14[%85, %c0_49], %84 {strides = array<i32>} : memref<16x128xf32, #tpu.memory_space<vmem>>, vector<1x128xf32>,
      %c6_i32 = arith.constant 6 : i32
      %87 = arith.addi %20, %c6_i32 : i32
      %88 = arith.index_cast %87 : i32 to index
      %89 = memref.load %arg1[%88] : memref<48xi32, #tpu.memory_space<smem>>
      %90 = arith.index_cast %89 : i32 to index
      %c0_50 = arith.constant 0 : index
      %91 = vector.load %arg12[%90, %c0_50] : memref<56x128xf32, #tpu.memory_space<vmem>>, vector<1x128xf32>
      %92 = arith.index_cast %c6_i32 : i32 to index
      %c0_51 = arith.constant 0 : index
      %93 = vector.load %arg13[%92, %c0_51] : memref<16x128xf32, #tpu.memory_space<vmem>>, vector<1x128xf32>
      tpu.vector_store %arg13[%92, %c0_51], %91 {strides = array<i32>} : memref<16x128xf32, #tpu.memory_space<vmem>>, vector<1x128xf32>,
      %94 = arith.index_cast %89 : i32 to index
      %c0_52 = arith.constant 0 : index
      %95 = vector.load %arg11[%94, %c0_52] : memref<56x128xf32, #tpu.memory_space<vmem>>, vector<1x128xf32>
      %96 = arith.index_cast %c6_i32 : i32 to index
      %c0_53 = arith.constant 0 : index
      %97 = vector.load %arg14[%96, %c0_53] : memref<16x128xf32, #tpu.memory_space<vmem>>, vector<1x128xf32>
      tpu.vector_store %arg14[%96, %c0_53], %95 {strides = array<i32>} : memref<16x128xf32, #tpu.memory_space<vmem>>, vector<1x128xf32>,
      %c7_i32 = arith.constant 7 : i32
      %98 = arith.addi %20, %c7_i32 : i32
      %99 = arith.index_cast %98 : i32 to index
      %100 = memref.load %arg1[%99] : memref<48xi32, #tpu.memory_space<smem>>
      %101 = arith.index_cast %100 : i32 to index
      %c0_54 = arith.constant 0 : index
      %102 = vector.load %arg12[%101, %c0_54] : memref<56x128xf32, #tpu.memory_space<vmem>>, vector<1x128xf32>
      %103 = arith.index_cast %c7_i32 : i32 to index
      %c0_55 = arith.constant 0 : index
      %104 = vector.load %arg13[%103, %c0_55] : memref<16x128xf32, #tpu.memory_space<vmem>>, vector<1x128xf32>
      tpu.vector_store %arg13[%103, %c0_55], %102 {strides = array<i32>} : memref<16x128xf32, #tpu.memory_space<vmem>>, vector<1x128xf32>,
      %105 = arith.index_cast %100 : i32 to index
      %c0_56 = arith.constant 0 : index
      %106 = vector.load %arg11[%105, %c0_56] : memref<56x128xf32, #tpu.memory_space<vmem>>, vector<1x128xf32>
      %107 = arith.index_cast %c7_i32 : i32 to index
      %c0_57 = arith.constant 0 : index
      %108 = vector.load %arg14[%107, %c0_57] : memref<16x128xf32, #tpu.memory_space<vmem>>, vector<1x128xf32>
      tpu.vector_store %arg14[%107, %c0_57], %106 {strides = array<i32>} : memref<16x128xf32, #tpu.memory_space<vmem>>, vector<1x128xf32>,
      %c8_i32 = arith.constant 8 : i32
      %109 = arith.addi %20, %c8_i32 : i32
      %110 = arith.index_cast %109 : i32 to index
      %111 = memref.load %arg1[%110] : memref<48xi32, #tpu.memory_space<smem>>
      %112 = arith.index_cast %111 : i32 to index
      %c0_58 = arith.constant 0 : index
      %113 = vector.load %arg12[%112, %c0_58] : memref<56x128xf32, #tpu.memory_space<vmem>>, vector<1x128xf32>
      %114 = arith.index_cast %c8_i32 : i32 to index
      %c0_59 = arith.constant 0 : index
      %115 = vector.load %arg13[%114, %c0_59] : memref<16x128xf32, #tpu.memory_space<vmem>>, vector<1x128xf32>
      tpu.vector_store %arg13[%114, %c0_59], %113 {strides = array<i32>} : memref<16x128xf32, #tpu.memory_space<vmem>>, vector<1x128xf32>,
      %116 = arith.index_cast %111 : i32 to index
      %c0_60 = arith.constant 0 : index
      %117 = vector.load %arg11[%116, %c0_60] : memref<56x128xf32, #tpu.memory_space<vmem>>, vector<1x128xf32>
      %118 = arith.index_cast %c8_i32 : i32 to index
      %c0_61 = arith.constant 0 : index
      %119 = vector.load %arg14[%118, %c0_61] : memref<16x128xf32, #tpu.memory_space<vmem>>, vector<1x128xf32>
      tpu.vector_store %arg14[%118, %c0_61], %117 {strides = array<i32>} : memref<16x128xf32, #tpu.memory_space<vmem>>, vector<1x128xf32>,
      %c9_i32 = arith.constant 9 : i32
      %120 = arith.addi %20, %c9_i32 : i32
      %121 = arith.index_cast %120 : i32 to index
      %122 = memref.load %arg1[%121] : memref<48xi32, #tpu.memory_space<smem>>
      %123 = arith.index_cast %122 : i32 to index
      %c0_62 = arith.constant 0 : index
      %124 = vector.load %arg12[%123, %c0_62] : memref<56x128xf32, #tpu.memory_space<vmem>>, vector<1x128xf32>
      %125 = arith.index_cast %c9_i32 : i32 to index
      %c0_63 = arith.constant 0 : index
      %126 = vector.load %arg13[%125, %c0_63] : memref<16x128xf32, #tpu.memory_space<vmem>>, vector<1x128xf32>
      tpu.vector_store %arg13[%125, %c0_63], %124 {strides = array<i32>} : memref<16x128xf32, #tpu.memory_space<vmem>>, vector<1x128xf32>,
      %127 = arith.index_cast %122 : i32 to index
      %c0_64 = arith.constant 0 : index
      %128 = vector.load %arg11[%127, %c0_64] : memref<56x128xf32, #tpu.memory_space<vmem>>, vector<1x128xf32>
      %129 = arith.index_cast %c9_i32 : i32 to index
      %c0_65 = arith.constant 0 : index
      %130 = vector.load %arg14[%129, %c0_65] : memref<16x128xf32, #tpu.memory_space<vmem>>, vector<1x128xf32>
      tpu.vector_store %arg14[%129, %c0_65], %128 {strides = array<i32>} : memref<16x128xf32, #tpu.memory_space<vmem>>, vector<1x128xf32>,
      %c10_i32 = arith.constant 10 : i32
      %131 = arith.addi %20, %c10_i32 : i32
      %132 = arith.index_cast %131 : i32 to index
      %133 = memref.load %arg1[%132] : memref<48xi32, #tpu.memory_space<smem>>
      %134 = arith.index_cast %133 : i32 to index
      %c0_66 = arith.constant 0 : index
      %135 = vector.load %arg12[%134, %c0_66] : memref<56x128xf32, #tpu.memory_space<vmem>>, vector<1x128xf32>
      %136 = arith.index_cast %c10_i32 : i32 to index
      %c0_67 = arith.constant 0 : index
      %137 = vector.load %arg13[%136, %c0_67] : memref<16x128xf32, #tpu.memory_space<vmem>>, vector<1x128xf32>
      tpu.vector_store %arg13[%136, %c0_67], %135 {strides = array<i32>} : memref<16x128xf32, #tpu.memory_space<vmem>>, vector<1x128xf32>,
      %138 = arith.index_cast %133 : i32 to index
      %c0_68 = arith.constant 0 : index
      %139 = vector.load %arg11[%138, %c0_68] : memref<56x128xf32, #tpu.memory_space<vmem>>, vector<1x128xf32>
      %140 = arith.index_cast %c10_i32 : i32 to index
      %c0_69 = arith.constant 0 : index
      %141 = vector.load %arg14[%140, %c0_69] : memref<16x128xf32, #tpu.memory_space<vmem>>, vector<1x128xf32>
      tpu.vector_store %arg14[%140, %c0_69], %139 {strides = array<i32>} : memref<16x128xf32, #tpu.memory_space<vmem>>, vector<1x128xf32>,
      %c11_i32 = arith.constant 11 : i32
      %142 = arith.addi %20, %c11_i32 : i32
      %143 = arith.index_cast %142 : i32 to index
      %144 = memref.load %arg1[%143] : memref<48xi32, #tpu.memory_space<smem>>
      %145 = arith.index_cast %144 : i32 to index
      %c0_70 = arith.constant 0 : index
      %146 = vector.load %arg12[%145, %c0_70] : memref<56x128xf32, #tpu.memory_space<vmem>>, vector<1x128xf32>
      %147 = arith.index_cast %c11_i32 : i32 to index
      %c0_71 = arith.constant 0 : index
      %148 = vector.load %arg13[%147, %c0_71] : memref<16x128xf32, #tpu.memory_space<vmem>>, vector<1x128xf32>
      tpu.vector_store %arg13[%147, %c0_71], %146 {strides = array<i32>} : memref<16x128xf32, #tpu.memory_space<vmem>>, vector<1x128xf32>,
      %149 = arith.index_cast %144 : i32 to index
      %c0_72 = arith.constant 0 : index
      %150 = vector.load %arg11[%149, %c0_72] : memref<56x128xf32, #tpu.memory_space<vmem>>, vector<1x128xf32>
      %151 = arith.index_cast %c11_i32 : i32 to index
      %c0_73 = arith.constant 0 : index
      %152 = vector.load %arg14[%151, %c0_73] : memref<16x128xf32, #tpu.memory_space<vmem>>, vector<1x128xf32>
      tpu.vector_store %arg14[%151, %c0_73], %150 {strides = array<i32>} : memref<16x128xf32, #tpu.memory_space<vmem>>, vector<1x128xf32>,
      %c12_i32 = arith.constant 12 : i32
      %153 = arith.addi %20, %c12_i32 : i32
      %154 = arith.index_cast %153 : i32 to index
      %155 = memref.load %arg1[%154] : memref<48xi32, #tpu.memory_space<smem>>
      %156 = arith.index_cast %155 : i32 to index
      %c0_74 = arith.constant 0 : index
      %157 = vector.load %arg12[%156, %c0_74] : memref<56x128xf32, #tpu.memory_space<vmem>>, vector<1x128xf32>
      %158 = arith.index_cast %c12_i32 : i32 to index
      %c0_75 = arith.constant 0 : index
      %159 = vector.load %arg13[%158, %c0_75] : memref<16x128xf32, #tpu.memory_space<vmem>>, vector<1x128xf32>
      tpu.vector_store %arg13[%158, %c0_75], %157 {strides = array<i32>} : memref<16x128xf32, #tpu.memory_space<vmem>>, vector<1x128xf32>,
      %160 = arith.index_cast %155 : i32 to index
      %c0_76 = arith.constant 0 : index
      %161 = vector.load %arg11[%160, %c0_76] : memref<56x128xf32, #tpu.memory_space<vmem>>, vector<1x128xf32>
      %162 = arith.index_cast %c12_i32 : i32 to index
      %c0_77 = arith.constant 0 : index
      %163 = vector.load %arg14[%162, %c0_77] : memref<16x128xf32, #tpu.memory_space<vmem>>, vector<1x128xf32>
      tpu.vector_store %arg14[%162, %c0_77], %161 {strides = array<i32>} : memref<16x128xf32, #tpu.memory_space<vmem>>, vector<1x128xf32>,
      %c13_i32 = arith.constant 13 : i32
      %164 = arith.addi %20, %c13_i32 : i32
      %165 = arith.index_cast %164 : i32 to index
      %166 = memref.load %arg1[%165] : memref<48xi32, #tpu.memory_space<smem>>
      %167 = arith.index_cast %166 : i32 to index
      %c0_78 = arith.constant 0 : index
      %168 = vector.load %arg12[%167, %c0_78] : memref<56x128xf32, #tpu.memory_space<vmem>>, vector<1x128xf32>
      %169 = arith.index_cast %c13_i32 : i32 to index
      %c0_79 = arith.constant 0 : index
      %170 = vector.load %arg13[%169, %c0_79] : memref<16x128xf32, #tpu.memory_space<vmem>>, vector<1x128xf32>
      tpu.vector_store %arg13[%169, %c0_79], %168 {strides = array<i32>} : memref<16x128xf32, #tpu.memory_space<vmem>>, vector<1x128xf32>,
      %171 = arith.index_cast %166 : i32 to index
      %c0_80 = arith.constant 0 : index
      %172 = vector.load %arg11[%171, %c0_80] : memref<56x128xf32, #tpu.memory_space<vmem>>, vector<1x128xf32>
      %173 = arith.index_cast %c13_i32 : i32 to index
      %c0_81 = arith.constant 0 : index
      %174 = vector.load %arg14[%173, %c0_81] : memref<16x128xf32, #tpu.memory_space<vmem>>, vector<1x128xf32>
      tpu.vector_store %arg14[%173, %c0_81], %172 {strides = array<i32>} : memref<16x128xf32, #tpu.memory_space<vmem>>, vector<1x128xf32>,
      %c14_i32 = arith.constant 14 : i32
      %175 = arith.addi %20, %c14_i32 : i32
      %176 = arith.index_cast %175 : i32 to index
      %177 = memref.load %arg1[%176] : memref<48xi32, #tpu.memory_space<smem>>
      %178 = arith.index_cast %177 : i32 to index
      %c0_82 = arith.constant 0 : index
      %179 = vector.load %arg12[%178, %c0_82] : memref<56x128xf32, #tpu.memory_space<vmem>>, vector<1x128xf32>
      %180 = arith.index_cast %c14_i32 : i32 to index
      %c0_83 = arith.constant 0 : index
      %181 = vector.load %arg13[%180, %c0_83] : memref<16x128xf32, #tpu.memory_space<vmem>>, vector<1x128xf32>
      tpu.vector_store %arg13[%180, %c0_83], %179 {strides = array<i32>} : memref<16x128xf32, #tpu.memory_space<vmem>>, vector<1x128xf32>,
      %182 = arith.index_cast %177 : i32 to index
      %c0_84 = arith.constant 0 : index
      %183 = vector.load %arg11[%182, %c0_84] : memref<56x128xf32, #tpu.memory_space<vmem>>, vector<1x128xf32>
      %184 = arith.index_cast %c14_i32 : i32 to index
      %c0_85 = arith.constant 0 : index
      %185 = vector.load %arg14[%184, %c0_85] : memref<16x128xf32, #tpu.memory_space<vmem>>, vector<1x128xf32>
      tpu.vector_store %arg14[%184, %c0_85], %183 {strides = array<i32>} : memref<16x128xf32, #tpu.memory_space<vmem>>, vector<1x128xf32>,
      %c15_i32 = arith.constant 15 : i32
      %186 = arith.addi %20, %c15_i32 : i32
      %187 = arith.index_cast %186 : i32 to index
      %188 = memref.load %arg1[%187] : memref<48xi32, #tpu.memory_space<smem>>
      %189 = arith.index_cast %188 : i32 to index
      %c0_86 = arith.constant 0 : index
      %190 = vector.load %arg12[%189, %c0_86] : memref<56x128xf32, #tpu.memory_space<vmem>>, vector<1x128xf32>
      %191 = arith.index_cast %c15_i32 : i32 to index
      %c0_87 = arith.constant 0 : index
      %192 = vector.load %arg13[%191, %c0_87] : memref<16x128xf32, #tpu.memory_space<vmem>>, vector<1x128xf32>
      tpu.vector_store %arg13[%191, %c0_87], %190 {strides = array<i32>} : memref<16x128xf32, #tpu.memory_space<vmem>>, vector<1x128xf32>,
      %193 = arith.index_cast %188 : i32 to index
      %c0_88 = arith.constant 0 : index
      %194 = vector.load %arg11[%193, %c0_88] : memref<56x128xf32, #tpu.memory_space<vmem>>, vector<1x128xf32>
      %195 = arith.index_cast %c15_i32 : i32 to index
      %c0_89 = arith.constant 0 : index
      %196 = vector.load %arg14[%195, %c0_89] : memref<16x128xf32, #tpu.memory_space<vmem>>, vector<1x128xf32>
      tpu.vector_store %arg14[%195, %c0_89], %194 {strides = array<i32>} : memref<16x128xf32, #tpu.memory_space<vmem>>, vector<1x128xf32>,
      %c16_i32_90 = arith.constant 16 : i32
      %197 = arith.index_cast %20 : i32 to index
      %c0_91 = arith.constant 0 : index
      %198 = vector.load %arg9[%197, %c0_91] : memref<48x640xf32, #tpu.memory_space<vmem>>, vector<16x640xf32>
      %c0_92 = arith.constant 0 : index
      %c0_93 = arith.constant 0 : index
      %199 = vector.load %arg13[%c0_92, %c0_93] : memref<16x128xf32, #tpu.memory_space<vmem>>, vector<16x128xf32>
      %c0_94 = arith.constant 0 : index
      %c0_95 = arith.constant 0 : index
      %200 = vector.load %arg5[%c0_94, %c0_95] : memref<128x640xf32, #tpu.memory_space<vmem>>, vector<128x640xf32>
      %cst_96 = arith.constant dense<0.000000e+00> : vector<16x640xf32>
      %201 = tpu.matmul %199, %200, %cst_96 {dimension_numbers = #tpu.dot_dimension_numbers<[1], [0], [0], [1], [0, 0, 1, 1], [], []>} : vector<16x128xf32>, vector<128x640xf32>, vector<16x640xf32> -> vector<16x640xf32>
      %202 = arith.addf %198, %201 : vector<16x640xf32>
      %203 = vector.extract_strided_slice %202 {offsets = [0, 0], sizes = [16, 128], strides = [1, 1]} : vector<16x640xf32> to vector<16x128xf32>
      %204 = arith.negf %203 : vector<16x128xf32>
      %205 = math.exp %204 : vector<16x128xf32>
      %cst_97 = arith.constant 1.000000e+00 : f32
      %206 = vector.broadcast %cst_97 : f32 to vector<16x128xf32>
      %207 = arith.addf %206, %205 : vector<16x128xf32>
      %208 = arith.divf %206, %207 : vector<16x128xf32>
      %209 = vector.extract_strided_slice %202 {offsets = [0, 128], sizes = [16, 128], strides = [1, 1]} : vector<16x640xf32> to vector<16x128xf32>
      %210 = arith.negf %209 : vector<16x128xf32>
      %211 = math.exp %210 : vector<16x128xf32>
      %cst_98 = arith.constant 1.000000e+00 : f32
      %212 = vector.broadcast %cst_98 : f32 to vector<16x128xf32>
      %213 = arith.addf %212, %211 : vector<16x128xf32>
      %214 = arith.divf %212, %213 : vector<16x128xf32>
      %215 = vector.extract_strided_slice %202 {offsets = [0, 256], sizes = [16, 128], strides = [1, 1]} : vector<16x640xf32> to vector<16x128xf32>
      %216 = arith.negf %215 : vector<16x128xf32>
      %217 = math.exp %216 : vector<16x128xf32>
      %cst_99 = arith.constant 1.000000e+00 : f32
      %218 = vector.broadcast %cst_99 : f32 to vector<16x128xf32>
      %219 = arith.addf %218, %217 : vector<16x128xf32>
      %220 = arith.divf %218, %219 : vector<16x128xf32>
      %221 = vector.extract_strided_slice %202 {offsets = [0, 384], sizes = [16, 128], strides = [1, 1]} : vector<16x640xf32> to vector<16x128xf32>
      %222 = math.tanh %221 : vector<16x128xf32>
      %223 = vector.extract_strided_slice %202 {offsets = [0, 512], sizes = [16, 128], strides = [1, 1]} : vector<16x640xf32> to vector<16x128xf32>
      %224 = arith.negf %223 : vector<16x128xf32>
      %225 = math.exp %224 : vector<16x128xf32>
      %cst_100 = arith.constant 1.000000e+00 : f32
      %226 = vector.broadcast %cst_100 : f32 to vector<16x128xf32>
      %227 = arith.addf %226, %225 : vector<16x128xf32>
      %228 = arith.divf %226, %227 : vector<16x128xf32>
      %229 = arith.mulf %208, %222 : vector<16x128xf32>
      %c0_101 = arith.constant 0 : index
      %c0_102 = arith.constant 0 : index
      %230 = vector.load %arg14[%c0_101, %c0_102] : memref<16x128xf32, #tpu.memory_space<vmem>>, vector<16x128xf32>
      %231 = arith.mulf %220, %230 : vector<16x128xf32>
      %232 = arith.addf %229, %231 : vector<16x128xf32>
      %233 = math.tanh %232 : vector<16x128xf32>
      %234 = arith.mulf %214, %233 : vector<16x128xf32>
      %235 = arith.mulf %228, %234 : vector<16x128xf32>
      %cst_103 = arith.constant 1.000000e+00 : f32
      %236 = vector.broadcast %cst_103 : f32 to vector<16x128xf32>
      %237 = arith.subf %236, %228 : vector<16x128xf32>
      %238 = arith.index_cast %20 : i32 to index
      %c0_104 = arith.constant 0 : index
      %239 = vector.load %arg10[%238, %c0_104] : memref<48x128xf32, #tpu.memory_space<vmem>>, vector<16x128xf32>
      %240 = arith.mulf %237, %239 : vector<16x128xf32>
      %241 = arith.addf %235, %240 : vector<16x128xf32>
      %242 = arith.index_cast %20 : i32 to index
      %c0_105 = arith.constant 0 : index
      %243 = vector.load %arg11[%242, %c0_105] : memref<56x128xf32, #tpu.memory_space<vmem>>, vector<16x128xf32>
      tpu.vector_store %arg11[%242, %c0_105], %232 {strides = array<i32>} : memref<56x128xf32, #tpu.memory_space<vmem>>, vector<16x128xf32>,
      %244 = arith.index_cast %20 : i32 to index
      %c0_106 = arith.constant 0 : index
      %245 = vector.load %arg12[%244, %c0_106] : memref<56x128xf32, #tpu.memory_space<vmem>>, vector<16x128xf32>
      tpu.vector_store %arg12[%244, %c0_106], %241 {strides = array<i32>} : memref<56x128xf32, #tpu.memory_space<vmem>>, vector<16x128xf32>,
      %246 = arith.index_cast %20 : i32 to index
      %c0_107 = arith.constant 0 : index
      %247 = vector.load %arg8[%246, %c0_107] : memref<48x128xf32, #tpu.memory_space<vmem>>, vector<16x128xf32>
      tpu.vector_store %arg8[%246, %c0_107], %241 {strides = array<i32>} : memref<48x128xf32, #tpu.memory_space<vmem>>, vector<16x128xf32>,
    }
    %c3_i32_22 = arith.constant 3 : i32
    return
  }
  func.func @transform_0(%arg0: i32, %arg1: memref<48xi32, #tpu.memory_space<smem>>) -> (i32, i32) {
    %c0_i32 = arith.constant 0 : i32
    %c0_i32_0 = arith.constant 0 : i32
    %c0_i32_1 = arith.constant 0 : i32
    return %c0_i32, %c0_i32_0 : i32, i32
  }
  func.func @transform_1(%arg0: i32, %arg1: memref<48xi32, #tpu.memory_space<smem>>) -> (i32, i32) {
    %c0_i32 = arith.constant 0 : i32
    %c0_i32_0 = arith.constant 0 : i32
    %c0_i32_1 = arith.constant 0 : i32
    return %c0_i32, %c0_i32_0 : i32, i32
  }
  func.func @transform_2(%arg0: i32, %arg1: memref<48xi32, #tpu.memory_space<smem>>) -> (i32, i32) {
    %c0_i32 = arith.constant 0 : i32
    %c0_i32_0 = arith.constant 0 : i32
    %c0_i32_1 = arith.constant 0 : i32
    return %c0_i32, %c0_i32_0 : i32, i32
  }
  func.func @transform_3(%arg0: i32, %arg1: memref<48xi32, #tpu.memory_space<smem>>) -> (i32, i32) {
    %c0_i32 = arith.constant 0 : i32
    %c0_i32_0 = arith.constant 0 : i32
    %c0_i32_1 = arith.constant 0 : i32
    return %c0_i32, %c0_i32_0 : i32, i32
  }
  func.func @transform_4(%arg0: i32, %arg1: memref<48xi32, #tpu.memory_space<smem>>) -> (i32, i32) {
    %c0_i32 = arith.constant 0 : i32
    %c0_i32_0 = arith.constant 0 : i32
    %c0_i32_1 = arith.constant 0 : i32
    return %c0_i32, %c0_i32_0 : i32, i32
  }
  func.func @transform_5(%arg0: i32, %arg1: memref<48xi32, #tpu.memory_space<smem>>) -> (i32, i32) {
    %c0_i32 = arith.constant 0 : i32
    %c0_i32_0 = arith.constant 0 : i32
    %c0_i32_1 = arith.constant 0 : i32
    return %c0_i32, %c0_i32_0 : i32, i32
  }
  func.func @transform_6(%arg0: i32, %arg1: memref<48xi32, #tpu.memory_space<smem>>) -> (i32, i32) {
    %c0_i32 = arith.constant 0 : i32
    %c0_i32_0 = arith.constant 0 : i32
    %c0_i32_1 = arith.constant 0 : i32
    return %c0_i32, %c0_i32_0 : i32, i32
  }
}

</mosaic_0001>

<bundles_post_ra>
// kernel: tpu_custom_call.1
= control target key start
LH: loop header
LB: loop body
LE: loop exit
PB: predicated region body
PF: predicated region fallthrough
CT: control target
= control target key end

     0   :  { %s1685_s27 = smov [#allocation9]   ;;  %s2097_s0 = inlined_call_operand.hbm [shape: s32[48], index: 0, kind: input, shape index: {}]   ;;  %s2098_s1 = inlined_call_operand.hbm [shape: f32[48,256], index: 1, kind: input, shape index: {}]   ;;  %s2099_s2 = inlined_call_operand.hbm [shape: f32[256,640], index: 2, kind: input, shape index: {}]   ;;  %s2100_s3 = inlined_call_operand.hbm [shape: f32[1,640], index: 3, kind: input, shape index: {}]   ;;  %s2101_s4 = inlined_call_operand.hbm [shape: f32[128,640], index: 4, kind: input, shape index: {}]   ;;  %s2102_s5 = inlined_call_operand.hbm [shape: f32[256,128], index: 5, kind: input, shape index: {}]   ;;  %s2103_s6 = inlined_call_operand.vmem [shape: f32[1,128], index: 6, kind: input, shape index: {}]   ;;  %s2104_s7 = inlined_call_operand.hbm [shape: f32[48,128], index: 7, kind: output, shape index: {}]  }
   0x1   :  { %s13_s26 = sshll.u32 %s2097_s0, 4  ;;  %s14_s26 = int_to_ptr.hbm [resolvable:$true] %s13_s26 }
   0x2   :  { %16 = dma.hbm_to_smem %s14_s26, 16, %s1685_s27, [#allocation8] }
   0x3   :  { %1671 = dma.done.wait [#allocation8], 16 }
   0x4   :  { %1672 = vsyncadd [#allocation8], 4294967280 }
   0x5   :  { %19 = sfence }
   0x6   :  { %20 = vsyncpa [#allocation11], 0 }
   0x7   :  { %21 = vsyncpa [#allocation14], 0 }
   0x8   :  { %22 = vsyncpa [#allocation17], 0  ;;  %s41_s30 = sshll.u32 %s2099_s2, 4  ;;  %s42_s30 = int_to_ptr.hbm [resolvable:$true] %s41_s30 }
   0x9   :  { %23 = vsyncpa [#allocation12], 0  ;;  %s1686_s8 = smov [#allocation13]   ;;  %s65_s11 = sshll.u32 %s2101_s4, 4  ;;  %s66_s11 = int_to_ptr.hbm [resolvable:$true] %s65_s11 }
   0xa   :  { %s43_s9 = sshll.u32 %s1686_s8, 4  ;;  %s1687_s12 = smov 640   ;;  %s44_s9 = int_to_ptr.vmem [resolvable:$true] %s43_s9 }
   0xb   :  { %s1688_s13 = smov 40   ;;  %s1689_s14 = smov [#allocation16]  }
   0xc   :  { %49 = dma.hbm_to_vmem [thread:$0]  %s42_s30, 20480, %s44_s9, [#allocation14], %s1687_s12, %s1687_s12, %s1688_s13  }
   0xd   :  { %s67_s15 = sshll.u32 %s1689_s14, 4  ;;  %s28_s18 = sshll.u32 %s2098_s1, 4  ;;  %s68_s15 = int_to_ptr.vmem [resolvable:$true] %s67_s15  ;;  %s29_s18 = int_to_ptr.hbm [resolvable:$true] %s28_s18 }
   0xe   :  { %73 = dma.hbm_to_vmem [thread:$0]  %s66_s11, 10240, %s68_s15, [#allocation17], %s1687_s12, %s1687_s12, %s1688_s13  }
   0xf   :  { %s1690_s2 = smov [#allocation10]   ;;  %s55_s4 = sshll.u32 %s2100_s3, 4  ;;  %s56_s4 = int_to_ptr.hbm [resolvable:$true] %s55_s4 }
  0x10   :  { %s30_s19 = sshll.u32 %s1690_s2, 4  ;;  %s1691_s22 = smov 256   ;;  %s31_s19 = int_to_ptr.vmem [resolvable:$true] %s30_s19 }
  0x11   :  { %s1692_s23 = smov 16   ;;  %s1693_s24 = smov [#allocation15]  }
  0x12   :  { %36 = dma.hbm_to_vmem [thread:$0]  %s29_s18, 1536, %s31_s19, [#allocation11], %s1691_s22, %s1691_s22, %s1692_s23  }
  0x13   :  { %s57_s25 = sshll.u32 %s1693_s24, 4  ;;  %s78_s1 = sshll.u32 %s2102_s5, 4  ;;  %s58_s25 = int_to_ptr.vmem [resolvable:$true] %s57_s25  ;;  %s79_s1 = int_to_ptr.hbm [resolvable:$true] %s78_s1 }
  0x14   :  { %60 = dma.hbm_to_vmem [thread:$0]  %s56_s4, 80, %s58_s25, [#allocation14]  }
  0x15   :  { %s1694_s28 = smov [#allocation18]   ;;  %s1695_s30 = smov 128  }
  0x16   :  { %s80_s29 = sshll.u32 %s1694_s28, 4  ;;  %s1696_s8 = smov 8   ;;  %s81_s29 = int_to_ptr.vmem [resolvable:$true] %s80_s29 }
  0x17   :  { %86 = dma.hbm_to_vmem [thread:$0]  %s79_s1, 4096, %s81_s29, [#allocation17], %s1695_s30, %s1695_s30, %s1696_s8  }
  0x18   :  { %1673 = dma.done.wait [#allocation11], 1536  }
  0x19   :  { %1674 = vsyncadd [#allocation11], 4294965760 }
  0x1a   :  { %1675 = dma.done.wait [#allocation14], 20560  }
  0x1b   :  { %1676 = vsyncadd [#allocation14], 4294946736 }
  0x1c   :  { %1677 = dma.done.wait [#allocation17], 14336  }
  0x1d   :  { %1678 = vsyncadd [#allocation17], 4294952960  ;;  %v1697_v0 = vmov 0.0   ;;  %v211_v1 = vld [vmem:[#allocation13 + $0x260] sm:$0xff]  ;;  %v206_v2 = vld [vmem:[#allocation13 + $0x238] sm:$0xff] }
  0x1e   :  { %109 = vst [vmem:[#allocation4] sm:$0xff] %v1697_v0  ;;  %v291_v3 = vld [vmem:[#allocation13 + $0x4e0] sm:$0xff]  ;;  %377 = vmatpush.msra.mxu2 %v211_v1  ;;  %v286_v4 = vld [vmem:[#allocation13 + $0x4b8] sm:$0xff]  ;;  %v201_v6 = vld [vmem:[#allocation13 + $0x210] sm:$0xff] }
  0x1f   :  { %110 = vst [vmem:[#allocation4 + $0x8] sm:$0xff] %v1697_v0  ;;  %412 = vmatpush.msra.mxu3 %v291_v3  ;;  %v210_v5 = vld [vmem:[#allocation13 + $0x258] sm:$0xff]  ;;  %v281_v7 = vld [vmem:[#allocation13 + $0x490] sm:$0xff]  ;;  %v196_v9 = vld [vmem:[#allocation13 + $0x1e8] sm:$0xff] }
  0x20   :  { %111 = vst [vmem:[#allocation4 + $0x10] sm:$0xff] %v1697_v0  ;;  %307 = vmatpush.msra.mxu0 %v210_v5  ;;  %v205_v8 = vld [vmem:[#allocation13 + $0x230] sm:$0xff]  ;;  %378 = vmatpush.msra.mxu2 %v206_v2  ;;  %v290_v10 = vld [vmem:[#allocation13 + $0x4d8] sm:$0xff]  ;;  %v276_v11 = vld [vmem:[#allocation13 + $0x468] sm:$0xff] }
  0x21   :  { %112 = vst [vmem:[#allocation4 + $0x18] sm:$0xff] %v1697_v0  ;;  %413 = vmatpush.msra.mxu3 %v286_v4  ;;  %342 = vmatpush.msra.mxu1 %v290_v10  ;;  %v200_v12 = vld [vmem:[#allocation13 + $0x208] sm:$0xff]  ;;  %v285_v13 = vld [vmem:[#allocation13 + $0x4b0] sm:$0xff]  ;;  %v195_v14 = vld [vmem:[#allocation13 + $0x1e0] sm:$0xff] }
  0x22   :  { %113 = vst [vmem:[#allocation4 + $0x20] sm:$0xff] %v1697_v0  ;;  %308 = vmatpush.msra.mxu0 %v205_v8  ;;  %379 = vmatpush.msra.mxu2 %v201_v6  ;;  %v280_v15 = vld [vmem:[#allocation13 + $0x488] sm:$0xff]  ;;  %v191_v16 = vld [vmem:[#allocation13 + $0x1c0] sm:$0xff]  ;;  %v190_v18 = vld [vmem:[#allocation13 + $0x1b8] sm:$0xff] }
  0x23   :  { %114 = vst [vmem:[#allocation4 + $0x28] sm:$0xff] %v1697_v0  ;;  %414 = vmatpush.msra.mxu3 %v281_v7  ;;  %343 = vmatpush.msra.mxu1 %v285_v13  ;;  %v271_v17 = vld [vmem:[#allocation13 + $0x440] sm:$0xff]  ;;  %v186_v20 = vld [vmem:[#allocation13 + $0x198] sm:$0xff]  ;;  %v185_v22 = vld [vmem:[#allocation13 + $0x190] sm:$0xff] }
  0x24   :  { %115 = vst [vmem:[#allocation4 + $0x30] sm:$0xff] %v1697_v0  ;;  %309 = vmatpush.msra.mxu0 %v200_v12  ;;  %380 = vmatpush.msra.mxu2 %v196_v9  ;;  %v275_v19 = vld [vmem:[#allocation13 + $0x460] sm:$0xff]  ;;  %v266_v21 = vld [vmem:[#allocation13 + $0x418] sm:$0xff]  ;;  %v181_v24 = vld [vmem:[#allocation13 + $0x170] sm:$0xff] }
  0x25   :  { %116 = vst [vmem:[#allocation5] sm:$0xff] %v1697_v0  ;;  %415 = vmatpush.msra.mxu3 %v276_v11  ;;  %344 = vmatpush.msra.mxu1 %v280_v15  ;;  %v270_v23 = vld [vmem:[#allocation13 + $0x438] sm:$0xff]  ;;  %v261_v25 = vld [vmem:[#allocation13 + $0x3f0] sm:$0xff]  ;;  %v180_v26 = vld [vmem:[#allocation13 + $0x168] sm:$0xff] }
  0x26   :  { %117 = vst [vmem:[#allocation5 + $0x8] sm:$0xff] %v1697_v0  ;;  %310 = vmatpush.msra.mxu0 %v195_v14  ;;  %381 = vmatpush.msra.mxu2 %v191_v16  ;;  %v265_v27 = vld [vmem:[#allocation13 + $0x410] sm:$0xff]  ;;  %v176_v28 = vld [vmem:[#allocation13 + $0x148] sm:$0xff]  ;;  %v175_v30 = vld [vmem:[#allocation13 + $0x140] sm:$0xff] }
  0x27   :  { %118 = vst [vmem:[#allocation5 + $0x10] sm:$0xff] %v1697_v0  ;;  %416 = vmatpush.msra.mxu3 %v271_v17  ;;  %345 = vmatpush.msra.mxu1 %v275_v19  ;;  %v256_v29 = vld [vmem:[#allocation13 + $0x3c8] sm:$0xff]  ;;  %v171_v32 = vld [vmem:[#allocation13 + $0x120] sm:$0xff]  ;;  %v170_v34 = vld [vmem:[#allocation13 + $0x118] sm:$0xff] }
  0x28   :  { %119 = vst [vmem:[#allocation5 + $0x18] sm:$0xff] %v1697_v0  ;;  %311 = vmatpush.msra.mxu0 %v190_v18  ;;  %382 = vmatpush.msra.mxu2 %v186_v20  ;;  %v260_v31 = vld [vmem:[#allocation13 + $0x3e8] sm:$0xff]  ;;  %v251_v33 = vld [vmem:[#allocation13 + $0x3a0] sm:$0xff]  ;;  %v166_v36 = vld [vmem:[#allocation13 + $0xf8] sm:$0xff] }
  0x29   :  { %120 = vst [vmem:[#allocation5 + $0x20] sm:$0xff] %v1697_v0  ;;  %417 = vmatpush.msra.mxu3 %v266_v21  ;;  %346 = vmatpush.msra.mxu1 %v270_v23  ;;  %v255_v35 = vld [vmem:[#allocation13 + $0x3c0] sm:$0xff]  ;;  %v246_v37 = vld [vmem:[#allocation13 + $0x378] sm:$0xff]  ;;  %v165_v38 = vld [vmem:[#allocation13 + $0xf0] sm:$0xff] }
  0x2a   :  { %121 = vst [vmem:[#allocation5 + $0x28] sm:$0xff] %v1697_v0  ;;  %312 = vmatpush.msra.mxu0 %v185_v22  ;;  %383 = vmatpush.msra.mxu2 %v181_v24  ;;  %v250_v39 = vld [vmem:[#allocation13 + $0x398] sm:$0xff]  ;;  %v161_v40 = vld [vmem:[#allocation13 + $0xd0] sm:$0xff]  ;;  %v160_v42 = vld [vmem:[#allocation13 + $0xc8] sm:$0xff] }
  0x2b   :  { %122 = vst [vmem:[#allocation5 + $0x30] sm:$0xff] %v1697_v0  ;;  %418 = vmatpush.msra.mxu3 %v261_v25  ;;  %347 = vmatpush.msra.mxu1 %v265_v27  ;;  %v241_v41 = vld [vmem:[#allocation13 + $0x350] sm:$0xff]  ;;  %v156_v44 = vld [vmem:[#allocation13 + $0xa8] sm:$0xff]  ;;  %v155_v46 = vld [vmem:[#allocation13 + $0xa0] sm:$0xff] }
  0x2c   :  { %313 = vmatpush.msra.mxu0 %v180_v26  ;;  %384 = vmatpush.msra.mxu2 %v176_v28  ;;  %v245_v43 = vld [vmem:[#allocation13 + $0x370] sm:$0xff]  ;;  %v236_v45 = vld [vmem:[#allocation13 + $0x328] sm:$0xff]  ;;  %v151_v48 = vld [vmem:[#allocation13 + $0x80] sm:$0xff] }
  0x2d   :  { %419 = vmatpush.msra.mxu3 %v256_v29  ;;  %348 = vmatpush.msra.mxu1 %v260_v31  ;;  %v240_v47 = vld [vmem:[#allocation13 + $0x348] sm:$0xff]  ;;  %v231_v49 = vld [vmem:[#allocation13 + $0x300] sm:$0xff]  ;;  %v150_v50 = vld [vmem:[#allocation13 + $0x78] sm:$0xff] }
  0x2e   :  { %314 = vmatpush.msra.mxu0 %v175_v30  ;;  %385 = vmatpush.msra.mxu2 %v171_v32  ;;  %v235_v51 = vld [vmem:[#allocation13 + $0x320] sm:$0xff]  ;;  %v146_v52 = vld [vmem:[#allocation13 + $0x58] sm:$0xff]  ;;  %v145_v54 = vld [vmem:[#allocation13 + $0x50] sm:$0xff] }
  0x2f   :  { %420 = vmatpush.msra.mxu3 %v251_v33  ;;  %349 = vmatpush.msra.mxu1 %v255_v35  ;;  %v226_v53 = vld [vmem:[#allocation13 + $0x2d8] sm:$0xff]  ;;  %v141_v56 = vld [vmem:[#allocation13 + $0x30] sm:$0xff]  ;;  %v140_v58 = vld [vmem:[#allocation13 + $0x28] sm:$0xff] }
  0x30   :  { %315 = vmatpush.msra.mxu0 %v170_v34  ;;  %386 = vmatpush.msra.mxu2 %v166_v36  ;;  %v230_v55 = vld [vmem:[#allocation13 + $0x2f8] sm:$0xff]  ;;  %v221_v57 = vld [vmem:[#allocation13 + $0x2b0] sm:$0xff]  ;;  %v136_v60 = vld [vmem:[#allocation13 + $0x8] sm:$0xff] }
  0x31   :  { %421 = vmatpush.msra.mxu3 %v246_v37  ;;  %350 = vmatpush.msra.mxu1 %v250_v39  ;;  %v225_v59 = vld [vmem:[#allocation13 + $0x2d0] sm:$0xff]  ;;  %v216_v61 = vld [vmem:[#allocation13 + $0x288] sm:$0xff]  ;;  %v1760_v62 = vld [vmem:[#allocation10] sm:$0xff] }
  0x32   :  { %316 = vmatpush.msra.mxu0 %v165_v38  ;;  %387 = vmatpush.msra.mxu2 %v161_v40  ;;  %v1762_v63 = vld [vmem:[#allocation10 + $0x8] sm:$0xff]  ;;  %v213_v0 = vld [vmem:[#allocation13 + $0x270] sm:$0xff]  ;;  %v135_v2 = vld [vmem:[#allocation13] sm:$0xff] }
  0x33   :  { %422 = vmatpush.msra.mxu3 %v241_v41  ;;  %351 = vmatpush.msra.mxu1 %v245_v43  ;;  %v293_v1 = vld [vmem:[#allocation13 + $0x4f0] sm:$0xff]  ;;  %v220_v3 = vld [vmem:[#allocation13 + $0x2a8] sm:$0xff]  ;;  %v215_v6 = vld [vmem:[#allocation13 + $0x280] sm:$0xff] }
  0x34   :  { %317 = vmatpush.msra.mxu0 %v160_v42  ;;  %388 = vmatpush.msra.mxu2 %v156_v44  ;;  %v208_v4 = vld [vmem:[#allocation13 + $0x248] sm:$0xff]  ;;  %v203_v8 = vld [vmem:[#allocation13 + $0x220] sm:$0xff]  ;;  %v1767_v12 = vld [vmem:[#allocation10 + $0x10] sm:$0xff] }
  0x35   :  { %423 = vmatpush.msra.mxu3 %v236_v45  ;;  %352 = vmatpush.msra.mxu1 %v240_v47  ;;  %v288_v5 = vld [vmem:[#allocation13 + $0x4c8] sm:$0xff]  ;;  %v283_v9 = vld [vmem:[#allocation13 + $0x4a0] sm:$0xff]  ;;  %v1769_v13 = vld [vmem:[#allocation10 + $0x18] sm:$0xff] }
  0x36   :  { %318 = vmatpush.msra.mxu0 %v155_v46  ;;  %389 = vmatpush.msra.mxu2 %v151_v48  ;;  %v212_v7 = vld [vmem:[#allocation13 + $0x268] sm:$0xff]  ;;  %v207_v11 = vld [vmem:[#allocation13 + $0x240] sm:$0xff]  ;;  %v198_v14 = vld [vmem:[#allocation13 + $0x1f8] sm:$0xff] }
  0x37   :  { %424 = vmatpush.msra.mxu3 %v231_v49  ;;  %353 = vmatpush.msra.mxu1 %v235_v51  ;;  %v292_v10 = vld [vmem:[#allocation13 + $0x4e8] sm:$0xff]  ;;  %v287_v15 = vld [vmem:[#allocation13 + $0x4c0] sm:$0xff]  ;;  %v278_v16 = vld [vmem:[#allocation13 + $0x478] sm:$0xff] }
  0x38   :  { %319 = vmatpush.msra.mxu0 %v150_v50  ;;  %390 = vmatpush.msra.mxu2 %v146_v52  ;;  %v202_v17 = vld [vmem:[#allocation13 + $0x218] sm:$0xff]  ;;  %v193_v18 = vld [vmem:[#allocation13 + $0x1d0] sm:$0xff]  ;;  %v188_v22 = vld [vmem:[#allocation13 + $0x1a8] sm:$0xff] }
  0x39   :  { %425 = vmatpush.msra.mxu3 %v226_v53  ;;  %354 = vmatpush.msra.mxu1 %v230_v55  ;;  %v282_v19 = vld [vmem:[#allocation13 + $0x498] sm:$0xff]  ;;  %v273_v20 = vld [vmem:[#allocation13 + $0x450] sm:$0xff]  ;;  %v268_v23 = vld [vmem:[#allocation13 + $0x428] sm:$0xff] }
  0x3a   :  { %320 = vmatpush.msra.mxu0 %v145_v54  ;;  %391 = vmatpush.msra.mxu2 %v141_v56  ;;  %v197_v21 = vld [vmem:[#allocation13 + $0x1f0] sm:$0xff]  ;;  %v192_v25 = vld [vmem:[#allocation13 + $0x1c8] sm:$0xff]  ;;  %v1775_v26 = vld [vmem:[#allocation10 + $0x20] sm:$0xff] }
  0x3b   :  { %426 = vmatpush.msra.mxu3 %v221_v57  ;;  %355 = vmatpush.msra.mxu1 %v225_v59  ;;  %v277_v24 = vld [vmem:[#allocation13 + $0x470] sm:$0xff]  ;;  %v1777_v27 = vld [vmem:[#allocation10 + $0x28] sm:$0xff]  ;;  %v183_v28 = vld [vmem:[#allocation13 + $0x180] sm:$0xff] }
  0x3c   :  { %321 = vmatpush.msra.mxu0 %v140_v58  ;;  %392 = vmatpush.msra.mxu2 %v136_v60  ;;  %v272_v29 = vld [vmem:[#allocation13 + $0x448] sm:$0xff]  ;;  %v263_v30 = vld [vmem:[#allocation13 + $0x400] sm:$0xff]  ;;  %v178_v32 = vld [vmem:[#allocation13 + $0x158] sm:$0xff] }
  0x3d   :  { %427 = vmatpush.msra.mxu3 %v216_v61  ;;  %393 = vmatmul.f32.vlgmr.msra.gmra.mxu2 %v1760_v62  ;;  %v187_v31 = vld [vmem:[#allocation13 + $0x1a0] sm:$0xff]  ;;  %v258_v34 = vld [vmem:[#allocation13 + $0x3d8] sm:$0xff]  ;;  %v173_v36 = vld [vmem:[#allocation13 + $0x130] sm:$0xff] }
  0x3e   :  { %428 = vmatmul.f32.vlgmr.msra.gmra.mxu3 %v1762_v63  ;;  %517 = vmatpush.msrb.mxu2 %v213_v0  ;;  %v267_v33 = vld [vmem:[#allocation13 + $0x420] sm:$0xff]  ;;  %v182_v35 = vld [vmem:[#allocation13 + $0x178] sm:$0xff]  ;;  %v253_v37 = vld [vmem:[#allocation13 + $0x3b0] sm:$0xff] }
  0x3f   :  { %552 = vmatpush.msrb.mxu3 %v293_v1  ;;  %322 = vmatpush.msra.mxu0 %v135_v2  ;;  %v262_v38 = vld [vmem:[#allocation13 + $0x3f8] sm:$0xff]  ;;  %v177_v39 = vld [vmem:[#allocation13 + $0x150] sm:$0xff]  ;;  %v168_v42 = vld [vmem:[#allocation13 + $0x108] sm:$0xff] }
  0x40   :  { %356 = vmatpush.msra.mxu1 %v220_v3  ;;  %518 = vmatpush.msrb.mxu2 %v208_v4  ;;  %v1783_v40 = vld [vmem:[#allocation10 + $0x30] sm:$0xff]  ;;  %v1785_v41 = vld [vmem:[#allocation10 + $0x38] sm:$0xff]  ;;  %v248_v44 = vld [vmem:[#allocation13 + $0x388] sm:$0xff] }
  0x41   :  { %553 = vmatpush.msrb.mxu3 %v288_v5  ;;  %323 = vmatmul.f32.vlgmr.msra.gmra.mxu0 %v1760_v62  ;;  %v257_v43 = vld [vmem:[#allocation13 + $0x3d0] sm:$0xff]  ;;  %v172_v45 = vld [vmem:[#allocation13 + $0x128] sm:$0xff]  ;;  %v163_v46 = vld [vmem:[#allocation13 + $0xe0] sm:$0xff] }
  0x42   :  { %357 = vmatpush.msra.mxu1 %v215_v6  ;;  %447 = vmatpush.msrb.mxu0 %v212_v7  ;;  %v252_v47 = vld [vmem:[#allocation13 + $0x3a8] sm:$0xff]  ;;  %v243_v48 = vld [vmem:[#allocation13 + $0x360] sm:$0xff]  ;;  %v158_v50 = vld [vmem:[#allocation13 + $0xb8] sm:$0xff] }
  0x43   :  { %519 = vmatpush.msrb.mxu2 %v203_v8  ;;  %358 = vmatmul.f32.vlgmr.msra.gmra.mxu1 %v1762_v63  ;;  %v167_v49 = vld [vmem:[#allocation13 + $0x100] sm:$0xff]  ;;  %v238_v51 = vld [vmem:[#allocation13 + $0x338] sm:$0xff]  ;;  %v1793_v55 = vld [vmem:[#allocation10 + $0x48] sm:$0xff] }
  0x44   :  { %554 = vmatpush.msrb.mxu3 %v283_v9  ;;  %482 = vmatpush.msrb.mxu1 %v292_v10  ;;  %v247_v52 = vld [vmem:[#allocation13 + $0x380] sm:$0xff]  ;;  %v162_v53 = vld [vmem:[#allocation13 + $0xd8] sm:$0xff]  ;;  %v153_v56 = vld [vmem:[#allocation13 + $0x90] sm:$0xff] }
  0x45   :  { %448 = vmatpush.msrb.mxu0 %v207_v11  ;;  %396 = vmatmul.f32.gmra.mxu2 %v1767_v12  ;;  %v1791_v54 = vld [vmem:[#allocation10 + $0x40] sm:$0xff]  ;;  %v242_v57 = vld [vmem:[#allocation13 + $0x358] sm:$0xff]  ;;  %v233_v58 = vld [vmem:[#allocation13 + $0x310] sm:$0xff] }
  0x46   :  { %431 = vmatmul.f32.gmra.mxu3 %v1769_v13  ;;  %520 = vmatpush.msrb.mxu2 %v198_v14  ;;  %v157_v59 = vld [vmem:[#allocation13 + $0xb0] sm:$0xff]  ;;  %v148_v60 = vld [vmem:[#allocation13 + $0x68] sm:$0xff]  ;;  %v143_v2 = vld [vmem:[#allocation13 + $0x40] sm:$0xff] }
  0x47   :  { %483 = vmatpush.msrb.mxu1 %v287_v15  ;;  %555 = vmatpush.msrb.mxu3 %v278_v16  ;;  %v237_v61 = vld [vmem:[#allocation13 + $0x330] sm:$0xff]  ;;  %v228_v0 = vld [vmem:[#allocation13 + $0x2e8] sm:$0xff]  ;;  %v223_v3 = vld [vmem:[#allocation13 + $0x2c0] sm:$0xff] }
  0x48   :  { %449 = vmatpush.msrb.mxu0 %v202_v17  ;;  %521 = vmatpush.msrb.mxu2 %v193_v18  ;;  %v152_v1 = vld [vmem:[#allocation13 + $0x88] sm:$0xff]  ;;  %v147_v5 = vld [vmem:[#allocation13 + $0x60] sm:$0xff]  ;;  %v1799_v6 = vld [vmem:[#allocation10 + $0x50] sm:$0xff] }
  0x49   :  { %484 = vmatpush.msrb.mxu1 %v282_v19  ;;  %326 = vmatmul.f32.gmra.mxu0 %v1767_v12  ;;  %v232_v4 = vld [vmem:[#allocation13 + $0x308] sm:$0xff]  ;;  %v1801_v7 = vld [vmem:[#allocation10 + $0x58] sm:$0xff]  ;;  %v227_v9 = vld [vmem:[#allocation13 + $0x2e0] sm:$0xff] }
  0x4a   :  { %556 = vmatpush.msrb.mxu3 %v273_v20  ;;  %450 = vmatpush.msrb.mxu0 %v197_v21  ;;  %v138_v8 = vld [vmem:[#allocation13 + $0x18] sm:$0xff]  ;;  %v137_v17 = vld [vmem:[#allocation13 + $0x10] sm:$0xff] }
  0x4b   :  { %522 = vmatpush.msrb.mxu2 %v188_v22  ;;  %361 = vmatmul.f32.gmra.mxu1 %v1769_v13  ;;  %v218_v10 = vld [vmem:[#allocation13 + $0x298] sm:$0xff]  ;;  %v217_v20 = vld [vmem:[#allocation13 + $0x290] sm:$0xff] }
  0x4c   :  { %557 = vmatpush.msrb.mxu3 %v268_v23  ;;  %485 = vmatpush.msrb.mxu1 %v277_v24  ;;  %v142_v11 = vld [vmem:[#allocation13 + $0x38] sm:$0xff]  ;;  %v712_v22 = vld [vmem:[#allocation18 + $0x68] sm:$0xff] }
  0x4d   :  { %451 = vmatpush.msrb.mxu0 %v192_v25  ;;  %399 = vmatmul.f32.gmra.mxu2 %v1775_v26  ;;  %v714_v14 = vld [vmem:[#allocation18 + $0x78] sm:$0xff]  ;;  %v713_v18 = vld [vmem:[#allocation18 + $0x70] sm:$0xff]  ;;  %v728_v24 = vld [vmem:[#allocation18 + $0xe8] sm:$0xff] }
  0x4e   :  { %434 = vmatmul.f32.gmra.mxu3 %v1777_v27  ;;  %523 = vmatpush.msrb.mxu2 %v183_v28  ;;  %v222_v15 = vld [vmem:[#allocation13 + $0x2b8] sm:$0xff]  ;;  %v209_v25 = vld [vmem:[#allocation13 + $0x250] sm:$0xff]  ;;  %v711_v28 = vld [vmem:[#allocation18 + $0x60] sm:$0xff] }
  0x4f   :  { %486 = vmatpush.msrb.mxu1 %v272_v29  ;;  %558 = vmatpush.msrb.mxu3 %v263_v30  ;;  %v730_v16 = vld [vmem:[#allocation18 + $0xf8] sm:$0xff]  ;;  %v729_v19 = vld [vmem:[#allocation18 + $0xf0] sm:$0xff]  ;;  %v727_v30 = vld [vmem:[#allocation18 + $0xe0] sm:$0xff] }
  0x50   :  { %452 = vmatpush.msrb.mxu0 %v187_v31  ;;  %524 = vmatpush.msrb.mxu2 %v178_v32  ;;  %v214_v21 = vld [vmem:[#allocation13 + $0x278] sm:$0xff]  ;;  %v289_v29 = vld [vmem:[#allocation13 + $0x4d0] sm:$0xff]  ;;  %v204_v31 = vld [vmem:[#allocation13 + $0x228] sm:$0xff] }
  0x51   :  { %487 = vmatpush.msrb.mxu1 %v267_v33  ;;  %329 = vmatmul.f32.gmra.mxu0 %v1775_v26  ;;  %v294_v23 = vld [vmem:[#allocation13 + $0x4f8] sm:$0xff] }
  0x52   :  { %559 = vmatpush.msrb.mxu3 %v258_v34  ;;  %453 = vmatpush.msrb.mxu0 %v182_v35  ;;  %v710_v32 = vld [vmem:[#allocation18 + $0x58] sm:$0xff]  ;;  %v284_v34 = vld [vmem:[#allocation13 + $0x4a8] sm:$0xff] }
  0x53   :  { %525 = vmatpush.msrb.mxu2 %v173_v36  ;;  %364 = vmatmul.f32.gmra.mxu1 %v1777_v27  ;;  %v726_v33 = vld [vmem:[#allocation18 + $0xd8] sm:$0xff]  ;;  %v709_v36 = vld [vmem:[#allocation18 + $0x50] sm:$0xff] }
  0x54   :  { %560 = vmatpush.msrb.mxu3 %v253_v37  ;;  %488 = vmatpush.msrb.mxu1 %v262_v38  ;;  %v199_v35 = vld [vmem:[#allocation13 + $0x200] sm:$0xff]  ;;  %v725_v38 = vld [vmem:[#allocation18 + $0xd0] sm:$0xff] }
  0x55   :  { %454 = vmatpush.msrb.mxu0 %v177_v39  ;;  %402 = vmatmul.f32.gmra.mxu2 %v1783_v40  ;;  %v279_v37 = vld [vmem:[#allocation13 + $0x480] sm:$0xff]  ;;  %v194_v39 = vld [vmem:[#allocation13 + $0x1d8] sm:$0xff] }
  0x56   :  { %437 = vmatmul.f32.gmra.mxu3 %v1785_v41  ;;  %526 = vmatpush.msrb.mxu2 %v168_v42  ;;  %v708_v42 = vld [vmem:[#allocation18 + $0x48] sm:$0xff] }
  0x57   :  { %489 = vmatpush.msrb.mxu1 %v257_v43  ;;  %561 = vmatpush.msrb.mxu3 %v248_v44  ;;  %v274_v43 = vld [vmem:[#allocation13 + $0x458] sm:$0xff]  ;;  %v724_v44 = vld [vmem:[#allocation18 + $0xc8] sm:$0xff] }
  0x58   :  { %455 = vmatpush.msrb.mxu0 %v172_v45  ;;  %527 = vmatpush.msrb.mxu2 %v163_v46  ;;  %v189_v45 = vld [vmem:[#allocation13 + $0x1b0] sm:$0xff]  ;;  %v707_v46 = vld [vmem:[#allocation18 + $0x40] sm:$0xff] }
  0x59   :  { %490 = vmatpush.msrb.mxu1 %v252_v47  ;;  %332 = vmatmul.f32.gmra.mxu0 %v1783_v40  ;;  %v723_v47 = vld [vmem:[#allocation18 + $0xc0] sm:$0xff] }
  0x5a   :  { %562 = vmatpush.msrb.mxu3 %v243_v48  ;;  %456 = vmatpush.msrb.mxu0 %v167_v49  ;;  %v269_v48 = vld [vmem:[#allocation13 + $0x430] sm:$0xff]  ;;  %v184_v49 = vld [vmem:[#allocation13 + $0x188] sm:$0xff] }
  0x5b   :  { %528 = vmatpush.msrb.mxu2 %v158_v50  ;;  %367 = vmatmul.f32.gmra.mxu1 %v1785_v41  ;;  %v706_v50 = vld [vmem:[#allocation18 + $0x38] sm:$0xff] }
  0x5c   :  { %563 = vmatpush.msrb.mxu3 %v238_v51  ;;  %491 = vmatpush.msrb.mxu1 %v247_v52  ;;  %v264_v51 = vld [vmem:[#allocation13 + $0x408] sm:$0xff]  ;;  %v722_v52 = vld [vmem:[#allocation18 + $0xb8] sm:$0xff] }
  0x5d   :  { %457 = vmatpush.msrb.mxu0 %v162_v53  ;;  %405 = vmatmul.f32.gmra.mxu2 %v1791_v54  ;;  %v179_v53 = vld [vmem:[#allocation13 + $0x160] sm:$0xff] }
  0x5e   :  { %440 = vmatmul.f32.gmra.mxu3 %v1793_v55  ;;  %529 = vmatpush.msrb.mxu2 %v153_v56  ;;  %v705_v56 = vld [vmem:[#allocation18 + $0x30] sm:$0xff] }
  0x5f   :  { %492 = vmatpush.msrb.mxu1 %v242_v57  ;;  %564 = vmatpush.msrb.mxu3 %v233_v58  ;;  %v259_v57 = vld [vmem:[#allocation13 + $0x3e0] sm:$0xff]  ;;  %v721_v58 = vld [vmem:[#allocation18 + $0xb0] sm:$0xff] }
  0x60   :  { %458 = vmatpush.msrb.mxu0 %v157_v59  ;;  %530 = vmatpush.msrb.mxu2 %v148_v60  ;;  %v174_v59 = vld [vmem:[#allocation13 + $0x138] sm:$0xff]  ;;  %v704_v60 = vld [vmem:[#allocation18 + $0x28] sm:$0xff] }
  0x61   :  { %493 = vmatpush.msrb.mxu1 %v237_v61  ;;  %335 = vmatmul.f32.gmra.mxu0 %v1791_v54  ;;  %v720_v61 = vld [vmem:[#allocation18 + $0xa8] sm:$0xff] }
  0x62   :  { %565 = vmatpush.msrb.mxu3 %v228_v0  ;;  %459 = vmatpush.msrb.mxu0 %v152_v1  ;;  %v254_v0 = vld [vmem:[#allocation13 + $0x3b8] sm:$0xff]  ;;  %v169_v1 = vld [vmem:[#allocation13 + $0x110] sm:$0xff] }
  0x63   :  { %531 = vmatpush.msrb.mxu2 %v143_v2  ;;  %370 = vmatmul.f32.gmra.mxu1 %v1793_v55  ;;  %v703_v2 = vld [vmem:[#allocation18 + $0x20] sm:$0xff] }
  0x64   :  { %566 = vmatpush.msrb.mxu3 %v223_v3  ;;  %494 = vmatpush.msrb.mxu1 %v232_v4  ;;  %v249_v3 = vld [vmem:[#allocation13 + $0x390] sm:$0xff]  ;;  %v719_v4 = vld [vmem:[#allocation18 + $0xa0] sm:$0xff] }
  0x65   :  { %460 = vmatpush.msrb.mxu0 %v147_v5  ;;  %408 = vmatmul.f32.gmra.mxu2 %v1799_v6  ;;  %v164_v5 = vld [vmem:[#allocation13 + $0xe8] sm:$0xff] }
  0x66   :  { %443 = vmatmul.f32.gmra.mxu3 %v1801_v7  ;;  %532 = vmatpush.msrb.mxu2 %v138_v8  ;;  %v702_v8 = vld [vmem:[#allocation18 + $0x18] sm:$0xff] }
  0x67   :  { %495 = vmatpush.msrb.mxu1 %v227_v9  ;;  %567 = vmatpush.msrb.mxu3 %v218_v10  ;;  %v244_v9 = vld [vmem:[#allocation13 + $0x368] sm:$0xff]  ;;  %v718_v10 = vld [vmem:[#allocation18 + $0x98] sm:$0xff] }
  0x68   :  { %461 = vmatpush.msrb.mxu0 %v142_v11  ;;  %735 = vmatpush.msra.mxu2 %v714_v14  ;;  %v159_v11 = vld [vmem:[#allocation13 + $0xc0] sm:$0xff]  ;;  %v701_v14 = vld [vmem:[#allocation18 + $0x10] sm:$0xff] }
  0x69   :  { %496 = vmatpush.msrb.mxu1 %v222_v15  ;;  %338 = vmatmul.f32.gmra.mxu0 %v1799_v6  ;;  %v717_v15 = vld [vmem:[#allocation18 + $0x90] sm:$0xff] }
  0x6a   :  { %770 = vmatpush.msra.mxu3 %v730_v16  ;;  %462 = vmatpush.msrb.mxu0 %v137_v17  ;;  %v239_v16 = vld [vmem:[#allocation13 + $0x340] sm:$0xff]  ;;  %v154_v17 = vld [vmem:[#allocation13 + $0x98] sm:$0xff] }
  0x6b   :  { %736 = vmatpush.msra.mxu2 %v713_v18  ;;  %373 = vmatmul.f32.gmra.mxu1 %v1801_v7  ;;  %v700_v18 = vld [vmem:[#allocation18 + $0x8] sm:$0xff] }
  0x6c   :  { %771 = vmatpush.msra.mxu3 %v729_v19  ;;  %497 = vmatpush.msrb.mxu1 %v217_v20  ;;  %v234_v19 = vld [vmem:[#allocation13 + $0x318] sm:$0xff]  ;;  %v716_v20 = vld [vmem:[#allocation18 + $0x88] sm:$0xff] }
  0x6d   :  { %587 = vmatpush.msra.mxu0 %v214_v21  ;;  %533 = vmatmul.f32.vlgmr.msrb.gmra.mxu2 %v1760_v62  ;;  %v149_v21 = vld [vmem:[#allocation13 + $0x70] sm:$0xff] }
  0x6e   :  { %568 = vmatmul.f32.vlgmr.msrb.gmra.mxu3 %v1762_v63  ;;  %737 = vmatpush.msra.mxu2 %v712_v22  ;;  %v699_v22 = vld [vmem:[#allocation18] sm:$0xff] }
  0x6f   :  { %622 = vmatpush.msra.mxu1 %v294_v23  ;;  %772 = vmatpush.msra.mxu3 %v728_v24  ;;  %v229_v23 = vld [vmem:[#allocation13 + $0x2f0] sm:$0xff]  ;;  %v715_v24 = vld [vmem:[#allocation18 + $0x80] sm:$0xff] }
  0x70   :  { %588 = vmatpush.msra.mxu0 %v209_v25  ;;  %738 = vmatpush.msra.mxu2 %v711_v28  ;;  %v144_v25 = vld [vmem:[#allocation13 + $0x48] sm:$0xff] }
  0x71   :  { %623 = vmatpush.msra.mxu1 %v289_v29  ;;  %463 = vmatmul.f32.vlgmr.msrb.gmra.mxu0 %v1760_v62  ;;  %v224_v28 = vld [vmem:[#allocation13 + $0x2c8] sm:$0xff]  ;;  %v139_v29 = vld [vmem:[#allocation13 + $0x20] sm:$0xff] }
  0x72   :  { %773 = vmatpush.msra.mxu3 %v727_v30  ;;  %589 = vmatpush.msra.mxu0 %v204_v31  ;;  %v219_v30 = vld [vmem:[#allocation13 + $0x2a0] sm:$0xff] }
  0x73   :  { %739 = vmatpush.msra.mxu2 %v710_v32  ;;  %498 = vmatmul.f32.vlgmr.msrb.gmra.mxu1 %v1762_v63 }
  0x74   :  { %774 = vmatpush.msra.mxu3 %v726_v33  ;;  %624 = vmatpush.msra.mxu1 %v284_v34 }
  0x75   :  { %590 = vmatpush.msra.mxu0 %v199_v35  ;;  %536 = vmatmul.f32.gmra.mxu2 %v1767_v12 }
  0x76   :  { %571 = vmatmul.f32.gmra.mxu3 %v1769_v13  ;;  %740 = vmatpush.msra.mxu2 %v709_v36 }
  0x77   :  { %625 = vmatpush.msra.mxu1 %v279_v37  ;;  %775 = vmatpush.msra.mxu3 %v725_v38 }
  0x78   :  { %591 = vmatpush.msra.mxu0 %v194_v39  ;;  %741 = vmatpush.msra.mxu2 %v708_v42 }
  0x79   :  { %626 = vmatpush.msra.mxu1 %v274_v43  ;;  %466 = vmatmul.f32.gmra.mxu0 %v1767_v12 }
  0x7a   :  { %776 = vmatpush.msra.mxu3 %v724_v44  ;;  %592 = vmatpush.msra.mxu0 %v189_v45 }
  0x7b   :  { %742 = vmatpush.msra.mxu2 %v707_v46  ;;  %501 = vmatmul.f32.gmra.mxu1 %v1769_v13 }
  0x7c   :  { %777 = vmatpush.msra.mxu3 %v723_v47  ;;  %627 = vmatpush.msra.mxu1 %v269_v48 }
  0x7d   :  { %593 = vmatpush.msra.mxu0 %v184_v49  ;;  %539 = vmatmul.f32.gmra.mxu2 %v1775_v26 }
  0x7e   :  { %574 = vmatmul.f32.gmra.mxu3 %v1777_v27  ;;  %743 = vmatpush.msra.mxu2 %v706_v50 }
  0x7f   :  { %628 = vmatpush.msra.mxu1 %v264_v51  ;;  %778 = vmatpush.msra.mxu3 %v722_v52 }
  0x80   :  { %594 = vmatpush.msra.mxu0 %v179_v53  ;;  %744 = vmatpush.msra.mxu2 %v705_v56 }
  0x81   :  { %629 = vmatpush.msra.mxu1 %v259_v57  ;;  %469 = vmatmul.f32.gmra.mxu0 %v1775_v26 }
  0x82   :  { %779 = vmatpush.msra.mxu3 %v721_v58  ;;  %595 = vmatpush.msra.mxu0 %v174_v59 }
  0x83   :  { %745 = vmatpush.msra.mxu2 %v704_v60  ;;  %504 = vmatmul.f32.gmra.mxu1 %v1777_v27 }
  0x84   :  { %780 = vmatpush.msra.mxu3 %v720_v61  ;;  %630 = vmatpush.msra.mxu1 %v254_v0 }
  0x85   :  { %596 = vmatpush.msra.mxu0 %v169_v1  ;;  %542 = vmatmul.f32.gmra.mxu2 %v1783_v40 }
  0x86   :  { %577 = vmatmul.f32.gmra.mxu3 %v1785_v41  ;;  %746 = vmatpush.msra.mxu2 %v703_v2 }
  0x87   :  { %631 = vmatpush.msra.mxu1 %v249_v3  ;;  %781 = vmatpush.msra.mxu3 %v719_v4 }
  0x88   :  { %597 = vmatpush.msra.mxu0 %v164_v5  ;;  %747 = vmatpush.msra.mxu2 %v702_v8 }
  0x89   :  { %632 = vmatpush.msra.mxu1 %v244_v9  ;;  %472 = vmatmul.f32.gmra.mxu0 %v1783_v40 }
  0x8a   :  { %782 = vmatpush.msra.mxu3 %v718_v10  ;;  %598 = vmatpush.msra.mxu0 %v159_v11 }
  0x8b   :  { %748 = vmatpush.msra.mxu2 %v701_v14  ;;  %507 = vmatmul.f32.gmra.mxu1 %v1785_v41 }
  0x8c   :  { %783 = vmatpush.msra.mxu3 %v717_v15  ;;  %633 = vmatpush.msra.mxu1 %v239_v16 }
  0x8d   :  { %599 = vmatpush.msra.mxu0 %v154_v17  ;;  %545 = vmatmul.f32.gmra.mxu2 %v1791_v54 }
  0x8e   :  { %580 = vmatmul.f32.gmra.mxu3 %v1793_v55  ;;  %749 = vmatpush.msra.mxu2 %v700_v18 }
  0x8f   :  { %634 = vmatpush.msra.mxu1 %v234_v19  ;;  %784 = vmatpush.msra.mxu3 %v716_v20 }
  0x90   :  { %600 = vmatpush.msra.mxu0 %v149_v21  ;;  %750 = vmatpush.msra.mxu2 %v699_v22 }
  0x91   :  { %635 = vmatpush.msra.mxu1 %v229_v23  ;;  %475 = vmatmul.f32.gmra.mxu0 %v1791_v54 }
  0x92   :  { %785 = vmatpush.msra.mxu3 %v715_v24  ;;  %601 = vmatpush.msra.mxu0 %v144_v25 }
  0x93   :  { %636 = vmatpush.msra.mxu1 %v224_v28 }
  0x94   :  { %510 = vmatmul.f32.gmra.mxu1 %v1793_v55  ;;  %602 = vmatpush.msra.mxu0 %v139_v29 }
  0x95   :  { %637 = vmatpush.msra.mxu1 %v219_v30  ;;  %548 = vmatmul.f32.gmra.mxu2 %v1799_v6 }
  0x96   :  { %583 = vmatmul.f32.gmra.mxu3 %v1801_v7 }
  0x99   :  { %478 = vmatmul.f32.gmra.mxu0 %v1799_v6 }
  0x9c   :  { %513 = vmatmul.f32.gmra.mxu1 %v1801_v7 }
  0x9d   :  { %751 = vmatmul.f32.vlgmr.msra.gmra.mxu2 %v1760_v62 }
  0x9e   :  { %786 = vmatmul.f32.vlgmr.msra.gmra.mxu3 %v1762_v63 }
  0xa1   :  { %603 = vmatmul.f32.vlgmr.msra.gmra.mxu0 %v1760_v62  ;;  %v1846_v62 = vld [vmem:[#allocation15] sm:$0x1f] }
  0xa2   :  { %v299_v16 = vperm.slane %v1846_v62, 2  ;;  %v300_v17 = vperm.slane %v1846_v62, 3 }
  0xa4   :  { %638 = vmatmul.f32.vlgmr.msra.gmra.mxu1 %v1762_v63  ;;  %v297_v63 = vperm.slane %v1846_v62, 0 }
  0xa5   :  { %754 = vmatmul.f32.gmra.mxu2 %v1767_v12 }
  0xa6   :  { %789 = vmatmul.f32.gmra.mxu3 %v1769_v13 }
  0xa9   :  { %606 = vmatmul.f32.gmra.mxu0 %v1767_v12  ;;  %v298_v12 = vperm.slane %v1846_v62, 1 }
  0xac   :  { %641 = vmatmul.f32.gmra.mxu1 %v1769_v13 }
  0xad   :  { %757 = vmatmul.f32.gmra.mxu2 %v1775_v26 }
  0xae   :  { %792 = vmatmul.f32.gmra.mxu3 %v1777_v27 }
  0xb1   :  { %609 = vmatmul.f32.gmra.mxu0 %v1775_v26 }
  0xb4   :  { %644 = vmatmul.f32.gmra.mxu1 %v1777_v27 }
  0xb5   :  { %760 = vmatmul.f32.gmra.mxu2 %v1783_v40 }
  0xb6   :  { %795 = vmatmul.f32.gmra.mxu3 %v1785_v41 }
  0xb9   :  { %612 = vmatmul.f32.gmra.mxu0 %v1783_v40 }
  0xbc   :  { %647 = vmatmul.f32.gmra.mxu1 %v1785_v41 }
  0xbd   :  { %763 = vmatmul.f32.gmra.mxu2 %v1791_v54 }
  0xbe   :  { %798 = vmatmul.f32.gmra.mxu3 %v1793_v55  ;;  %v324_v13 = vpop.f32.mrf.mxu0 }
  0xbf   :  { %v325_v26 = vadd.f32 %v324_v13, %v297_v63 }
  0xc0   :  { %v394_v27 = vpop.f32.mrf.mxu2  ;;  %v359_v31 = vpop.f32.mrf.mxu1 }
  0xc1   :  { %v395_v32 = vadd.f32 %v394_v27, %v298_v12  ;;  %v360_v33 = vadd.f32 %v359_v31, %v325_v26  ;;  %v429_v34 = vpop.f32.mrf.mxu3  ;;  %615 = vmatmul.f32.gmra.mxu0 %v1791_v54 }
  0xc3   :  { %657 = vst [vmem:[#allocation2] sm:$0xff] %v360_v33  ;;  %v430_v40 = vadd.f32 %v429_v34, %v395_v32 }
  0xc4   :  { %650 = vmatmul.f32.gmra.mxu1 %v1793_v55 }
  0xc5   :  { %658 = vst [vmem:[#allocation2 + $0x8] sm:$0xff] %v430_v40  ;;  %766 = vmatmul.f32.gmra.mxu2 %v1799_v6 }
  0xc6   :  { %801 = vmatmul.f32.gmra.mxu3 %v1801_v7  ;;  %v327_v41 = vpop.f32.mrf.mxu0 }
  0xc7   :  { %v328_v35 = vadd.f32 %v327_v41, %v297_v63 }
  0xc8   :  { %v397_v36 = vpop.f32.mrf.mxu2  ;;  %v362_v37 = vpop.f32.mrf.mxu1 }
  0xc9   :  { %v398_v38 = vadd.f32 %v397_v36, %v298_v12  ;;  %v363_v39 = vadd.f32 %v362_v37, %v328_v35  ;;  %v432_v42 = vpop.f32.mrf.mxu3  ;;  %618 = vmatmul.f32.gmra.mxu0 %v1799_v6 }
  0xcb   :  { %662 = vst [vmem:[#allocation2 + $0x28] sm:$0xff] %v363_v39  ;;  %v433_v54 = vadd.f32 %v432_v42, %v398_v38 }
  0xcc   :  { %653 = vmatmul.f32.gmra.mxu1 %v1801_v7 }
  0xcd   :  { %663 = vst [vmem:[#allocation2 + $0x30] sm:$0xff] %v433_v54 }
  0xce   :  { %v330_v55 = vpop.f32.mrf.mxu0 }
  0xcf   :  { %v331_v43 = vadd.f32 %v330_v55, %v297_v63 }
  0xd0   :  { %v400_v44 = vpop.f32.mrf.mxu2  ;;  %v365_v45 = vpop.f32.mrf.mxu1 }
  0xd1   :  { %v401_v46 = vadd.f32 %v400_v44, %v298_v12  ;;  %v366_v47 = vadd.f32 %v365_v45, %v331_v43  ;;  %v435_v48 = vpop.f32.mrf.mxu3 }
  0xd3   :  { %667 = vst [vmem:[#allocation2 + $0x50] sm:$0xff] %v366_v47  ;;  %v436_v49 = vadd.f32 %v435_v48, %v401_v46 }
  0xd5   :  { %668 = vst [vmem:[#allocation2 + $0x58] sm:$0xff] %v436_v49 }
  0xd6   :  { %v333_v50 = vpop.f32.mrf.mxu0 }
  0xd7   :  { %v334_v51 = vadd.f32 %v333_v50, %v297_v63 }
  0xd8   :  { %v403_v52 = vpop.f32.mrf.mxu2  ;;  %v368_v53 = vpop.f32.mrf.mxu1 }
  0xd9   :  { %v404_v6 = vadd.f32 %v403_v52, %v298_v12  ;;  %v369_v56 = vadd.f32 %v368_v53, %v334_v51  ;;  %v438_v57 = vpop.f32.mrf.mxu3 }
  0xdb   :  { %672 = vst [vmem:[#allocation2 + $0x78] sm:$0xff] %v369_v56  ;;  %v439_v7 = vadd.f32 %v438_v57, %v404_v6 }
  0xdd   :  { %673 = vst [vmem:[#allocation2 + $0x80] sm:$0xff] %v439_v7 }
  0xde   :  { %v336_v58 = vpop.f32.mrf.mxu0 }
  0xdf   :  { %v337_v59 = vadd.f32 %v336_v58, %v297_v63 }
  0xe0   :  { %v406_v60 = vpop.f32.mrf.mxu2  ;;  %v371_v61 = vpop.f32.mrf.mxu1 }
  0xe1   :  { %v407_v0 = vadd.f32 %v406_v60, %v298_v12  ;;  %v372_v1 = vadd.f32 %v371_v61, %v337_v59  ;;  %v441_v2 = vpop.f32.mrf.mxu3  ;;  %v301_v61 = vperm.slane %v1846_v62, 4 }
  0xe3   :  { %677 = vst [vmem:[#allocation2 + $0xa0] sm:$0xff] %v372_v1  ;;  %v442_v3 = vadd.f32 %v441_v2, %v407_v0  ;;  %v1470_v0 = vld [vmem:[%s2103_s6] ss:$0 sm:$0xff]  ;;  %s1866_s6 = smov 0  }
  0xe5   :  { %678 = vst [vmem:[#allocation2 + $0xa8] sm:$0xff] %v442_v3 }
  0xe6   :  { %v339_v4 = vpop.f32.mrf.mxu0 }
  0xe7   :  { %v340_v5 = vadd.f32 %v339_v4, %v297_v63 }
  0xe8   :  { %v409_v8 = vpop.f32.mrf.mxu2  ;;  %v374_v9 = vpop.f32.mrf.mxu1 }
  0xe9   :  { %v410_v10 = vadd.f32 %v409_v8, %v298_v12  ;;  %v375_v11 = vadd.f32 %v374_v9, %v340_v5  ;;  %v444_v14 = vpop.f32.mrf.mxu3 }
  0xeb   :  { %682 = vst [vmem:[#allocation2 + $0xc8] sm:$0xff] %v375_v11  ;;  %v445_v15 = vadd.f32 %v444_v14, %v410_v10 }
  0xed   :  { %683 = vst [vmem:[#allocation2 + $0xd0] sm:$0xff] %v445_v15 }
  0xee   :  { %v464_v18 = vpop.f32.mrf.mxu0 }
  0xef   :  { %v465_v19 = vadd.f32 %v464_v18, %v299_v16 }
  0xf0   :  { %v534_v20 = vpop.f32.mrf.mxu2  ;;  %v499_v21 = vpop.f32.mrf.mxu1 }
  0xf1   :  { %v535_v22 = vadd.f32 %v534_v20, %v300_v17  ;;  %v500_v23 = vadd.f32 %v499_v21, %v465_v19  ;;  %v569_v24 = vpop.f32.mrf.mxu3 }
  0xf3   :  { %659 = vst [vmem:[#allocation2 + $0x10] sm:$0xff] %v500_v23  ;;  %v570_v25 = vadd.f32 %v569_v24, %v535_v22 }
  0xf5   :  { %660 = vst [vmem:[#allocation2 + $0x18] sm:$0xff] %v570_v25 }
  0xf6   :  { %v467_v28 = vpop.f32.mrf.mxu0 }
  0xf7   :  { %v468_v29 = vadd.f32 %v467_v28, %v299_v16 }
  0xf8   :  { %v537_v30 = vpop.f32.mrf.mxu2  ;;  %v502_v63 = vpop.f32.mrf.mxu1 }
  0xf9   :  { %v538_v12 = vadd.f32 %v537_v30, %v300_v17  ;;  %v503_v13 = vadd.f32 %v502_v63, %v468_v29  ;;  %v572_v26 = vpop.f32.mrf.mxu3 }
  0xfb   :  { %664 = vst [vmem:[#allocation2 + $0x38] sm:$0xff] %v503_v13  ;;  %v573_v27 = vadd.f32 %v572_v26, %v538_v12 }
  0xfd   :  { %665 = vst [vmem:[#allocation2 + $0x40] sm:$0xff] %v573_v27 }
  0xfe   :  { %v470_v31 = vpop.f32.mrf.mxu0 }
  0xff   :  { %v471_v32 = vadd.f32 %v470_v31, %v299_v16 }
 0x100   :  { %v540_v33 = vpop.f32.mrf.mxu2  ;;  %v505_v34 = vpop.f32.mrf.mxu1 }
 0x101   :  { %v541_v40 = vadd.f32 %v540_v33, %v300_v17  ;;  %v506_v41 = vadd.f32 %v505_v34, %v471_v32  ;;  %v575_v35 = vpop.f32.mrf.mxu3 }
 0x103   :  { %669 = vst [vmem:[#allocation2 + $0x60] sm:$0xff] %v506_v41  ;;  %v576_v36 = vadd.f32 %v575_v35, %v541_v40 }
 0x105   :  { %670 = vst [vmem:[#allocation2 + $0x68] sm:$0xff] %v576_v36 }
 0x106   :  { %v473_v37 = vpop.f32.mrf.mxu0 }
 0x107   :  { %v474_v38 = vadd.f32 %v473_v37, %v299_v16 }
 0x108   :  { %v543_v39 = vpop.f32.mrf.mxu2  ;;  %v508_v42 = vpop.f32.mrf.mxu1 }
 0x109   :  { %v544_v54 = vadd.f32 %v543_v39, %v300_v17  ;;  %v509_v55 = vadd.f32 %v508_v42, %v474_v38  ;;  %v578_v43 = vpop.f32.mrf.mxu3 }
 0x10b   :  { %674 = vst [vmem:[#allocation2 + $0x88] sm:$0xff] %v509_v55  ;;  %v579_v44 = vadd.f32 %v578_v43, %v544_v54 }
 0x10d   :  { %675 = vst [vmem:[#allocation2 + $0x90] sm:$0xff] %v579_v44 }
 0x10e   :  { %v476_v45 = vpop.f32.mrf.mxu0 }
 0x10f   :  { %v477_v46 = vadd.f32 %v476_v45, %v299_v16 }
 0x110   :  { %v546_v47 = vpop.f32.mrf.mxu2 }
 0x111   :  { %v511_v48 = vpop.f32.mrf.mxu1  ;;  %v547_v49 = vadd.f32 %v546_v47, %v300_v17  ;;  %v581_v51 = vpop.f32.mrf.mxu3 }
 0x112   :  { %v512_v50 = vadd.f32 %v511_v48, %v477_v46 }
 0x113   :  { %v582_v52 = vadd.f32 %v581_v51, %v547_v49 }
 0x114   :  { %679 = vst [vmem:[#allocation2 + $0xb0] sm:$0xff] %v512_v50 }
 0x115   :  { %680 = vst [vmem:[#allocation2 + $0xb8] sm:$0xff] %v582_v52 }
 0x116   :  { %v479_v53 = vpop.f32.mrf.mxu0 }
 0x117   :  { %v480_v6 = vadd.f32 %v479_v53, %v299_v16 }
 0x118   :  { %v549_v56 = vpop.f32.mrf.mxu2 }
 0x119   :  { %v514_v57 = vpop.f32.mrf.mxu1  ;;  %v550_v7 = vadd.f32 %v549_v56, %v300_v17  ;;  %v584_v59 = vpop.f32.mrf.mxu3 }
 0x11a   :  { %v515_v58 = vadd.f32 %v514_v57, %v480_v6 }
 0x11b   :  { %v585_v60 = vadd.f32 %v584_v59, %v550_v7 }
 0x11c   :  { %684 = vst [vmem:[#allocation2 + $0xd8] sm:$0xff] %v515_v58 }
 0x11d   :  { %685 = vst [vmem:[#allocation2 + $0xe0] sm:$0xff] %v585_v60 }
 0x11e   :  { %v604_v1 = vpop.f32.mrf.mxu0 }
 0x11f   :  { %v605_v2 = vadd.f32 %v604_v1, %v301_v61 }
 0x120   :  { %v752_v3 = vpop.f32.mrf.mxu2 }
 0x121   :  { %v639_v4 = vpop.f32.mrf.mxu1  ;;  %v753_v5 = vadd.f32 %v1470_v0, %v752_v3  ;;  %v787_v9 = vpop.f32.mrf.mxu3 }
 0x122   :  { %v640_v8 = vadd.f32 %v639_v4, %v605_v2 }
 0x123   :  { %v788_v10 = vadd.f32 %v787_v9, %v753_v5 }
 0x124   :  { %661 = vst [vmem:[#allocation2 + $0x20] sm:$0xff] %v640_v8 }
 0x125   :  { %805 = vst [vmem:[#allocation3] sm:$0xff] %v788_v10 }
 0x126   :  { %v607_v11 = vpop.f32.mrf.mxu0 }
 0x127   :  { %v608_v14 = vadd.f32 %v607_v11, %v301_v61 }
 0x128   :  { %v755_v15 = vpop.f32.mrf.mxu2 }
 0x129   :  { %v642_v16 = vpop.f32.mrf.mxu1  ;;  %v756_v62 = vadd.f32 %v1470_v0, %v755_v15  ;;  %v790_v18 = vpop.f32.mrf.mxu3 }
 0x12a   :  { %v643_v17 = vadd.f32 %v642_v16, %v608_v14 }
 0x12b   :  { %v791_v19 = vadd.f32 %v790_v18, %v756_v62 }
 0x12c   :  { %666 = vst [vmem:[#allocation2 + $0x48] sm:$0xff] %v643_v17 }
 0x12d   :  { %806 = vst [vmem:[#allocation3 + $0x8] sm:$0xff] %v791_v19 }
 0x12e   :  { %v610_v20 = vpop.f32.mrf.mxu0 }
 0x12f   :  { %v611_v21 = vadd.f32 %v610_v20, %v301_v61 }
 0x130   :  { %v758_v22 = vpop.f32.mrf.mxu2 }
 0x131   :  { %v645_v23 = vpop.f32.mrf.mxu1  ;;  %v759_v24 = vadd.f32 %v1470_v0, %v758_v22  ;;  %v793_v28 = vpop.f32.mrf.mxu3 }
 0x132   :  { %v646_v25 = vadd.f32 %v645_v23, %v611_v21 }
 0x133   :  { %v794_v29 = vadd.f32 %v793_v28, %v759_v24 }
 0x134   :  { %671 = vst [vmem:[#allocation2 + $0x70] sm:$0xff] %v646_v25 }
 0x135   :  { %807 = vst [vmem:[#allocation3 + $0x10] sm:$0xff] %v794_v29 }
 0x136   :  { %v613_v30 = vpop.f32.mrf.mxu0 }
 0x137   :  { %v614_v63 = vadd.f32 %v613_v30, %v301_v61 }
 0x138   :  { %v761_v12 = vpop.f32.mrf.mxu2 }
 0x139   :  { %v648_v13 = vpop.f32.mrf.mxu1  ;;  %v762_v26 = vadd.f32 %v1470_v0, %v761_v12  ;;  %v796_v31 = vpop.f32.mrf.mxu3 }
 0x13a   :  { %v649_v27 = vadd.f32 %v648_v13, %v614_v63 }
 0x13b   :  { %v797_v32 = vadd.f32 %v796_v31, %v762_v26 }
 0x13c   :  { %676 = vst [vmem:[#allocation2 + $0x98] sm:$0xff] %v649_v27 }
 0x13d   :  { %808 = vst [vmem:[#allocation3 + $0x18] sm:$0xff] %v797_v32 }
 0x13e   :  { %v616_v33 = vpop.f32.mrf.mxu0 }
 0x13f   :  { %v617_v34 = vadd.f32 %v616_v33, %v301_v61 }
 0x140   :  { %v764_v40 = vpop.f32.mrf.mxu2 }
 0x141   :  { %v651_v41 = vpop.f32.mrf.mxu1  ;;  %v765_v35 = vadd.f32 %v1470_v0, %v764_v40  ;;  %v799_v37 = vpop.f32.mrf.mxu3 }
 0x142   :  { %v652_v36 = vadd.f32 %v651_v41, %v617_v34 }
 0x143   :  { %v800_v38 = vadd.f32 %v799_v37, %v765_v35 }
 0x144   :  { %681 = vst [vmem:[#allocation2 + $0xc0] sm:$0xff] %v652_v36 }
 0x145   :  { %809 = vst [vmem:[#allocation3 + $0x20] sm:$0xff] %v800_v38 }
 0x146   :  { %v619_v39 = vpop.f32.mrf.mxu0 }
 0x147   :  { %v620_v42 = vadd.f32 %v619_v39, %v301_v61 }
 0x148   :  { %v767_v54 = vpop.f32.mrf.mxu2 }
 0x149   :  { %v654_v55 = vpop.f32.mrf.mxu1  ;;  %v768_v43 = vadd.f32 %v1470_v0, %v767_v54  ;;  %v802_v45 = vpop.f32.mrf.mxu3 }
 0x14a   :  { %v655_v44 = vadd.f32 %v654_v55, %v620_v42 }
 0x14b   :  { %v803_v46 = vadd.f32 %v802_v45, %v768_v43 }
 0x14c   :  { %686 = vst [vmem:[#allocation2 + $0xe8] sm:$0xff] %v655_v44 }
 0x14d   :  { %810 = vst [vmem:[#allocation3 + $0x28] sm:$0xff] %v803_v46 }
 0x14e LB: > { %v1037_v47 = vld [vmem:[#allocation16 + $0x258] sm:$0xff]  ;;  %v1038_v48 = vld [vmem:[#allocation16 + $0x260] sm:$0xff]  ;;  %v1039_v49 = vld [vmem:[#allocation16 + $0x268] sm:$0xff]  ;;  %s1872_s9 = sshll.u32 %s1683_s6, 4  ;;  %s816_s6 = sadd.s32 1, %s1683_s6   ;;  %s1683_s6 = sphi %s1866_s6, %s816_s6  }
 0x14f   : > { %1042 = vmatpush.msra.mxu0 %v1037_v47  ;;  %1065 = vmatpush.msra.mxu1 %v1038_v48  ;;  %v1032_v50 = vld [vmem:[#allocation16 + $0x230] sm:$0xff]  ;;  %v1033_v51 = vld [vmem:[#allocation16 + $0x238] sm:$0xff]  ;;  %v1034_v52 = vld [vmem:[#allocation16 + $0x240] sm:$0xff]  ;;  %s1875_s10 = sld [smem:[#allocation9 + %s1872_s9]]  ;;  %s825_s0 = sadd.s32 1, %s1872_s9 }
 0x150   : > { %1088 = vmatpush.msra.mxu2 %v1039_v49  ;;  %v1027_v53 = vld [vmem:[#allocation16 + $0x208] sm:$0xff]  ;;  %v1028_v6 = vld [vmem:[#allocation16 + $0x210] sm:$0xff]  ;;  %v1029_v56 = vld [vmem:[#allocation16 + $0x218] sm:$0xff]  ;;  %s1878_s11 = sld [smem:[#allocation9 + %s825_s0]]  ;;  %s833_s12 = sadd.s32 2, %s1872_s9 }
 0x151   : > { %1043 = vmatpush.msra.mxu0 %v1032_v50  ;;  %1066 = vmatpush.msra.mxu1 %v1033_v51  ;;  %v1022_v57 = vld [vmem:[#allocation16 + $0x1e0] sm:$0xff]  ;;  %v1023_v7 = vld [vmem:[#allocation16 + $0x1e8] sm:$0xff]  ;;  %v1024_v58 = vld [vmem:[#allocation16 + $0x1f0] sm:$0xff]  ;;  %s1881_s13 = sld [smem:[#allocation9 + %s833_s12]]  ;;  %s841_s14 = sadd.s32 3, %s1872_s9 }
 0x152   : > { %1089 = vmatpush.msra.mxu2 %v1034_v52  ;;  %v1017_v59 = vld [vmem:[#allocation16 + $0x1b8] sm:$0xff]  ;;  %v1018_v60 = vld [vmem:[#allocation16 + $0x1c0] sm:$0xff]  ;;  %s1884_s15 = sld [smem:[#allocation9 + %s841_s14]]  ;;  %s849_s16 = sadd.s32 4, %s1872_s9  ;;  %v1019_v61 = vld [vmem:[#allocation16 + $0x1c8] sm:$0xff] }
 0x153   : > { %1044 = vmatpush.msra.mxu0 %v1027_v53  ;;  %1067 = vmatpush.msra.mxu1 %v1028_v6  ;;  %s1887_s17 = sld [smem:[#allocation9 + %s849_s16]]  ;;  %s857_s18 = sadd.s32 5, %s1872_s9  ;;  %v1012_v0 = vld [vmem:[#allocation16 + $0x190] sm:$0xff]  ;;  %v1013_v1 = vld [vmem:[#allocation16 + $0x198] sm:$0xff]  ;;  %v1014_v3 = vld [vmem:[#allocation16 + $0x1a0] sm:$0xff] }
 0x154   : > { %1090 = vmatpush.msra.mxu2 %v1029_v56  ;;  %v1040_v2 = vld [vmem:[#allocation16 + $0x270] sm:$0xff]  ;;  %s1890_s2 = sld [smem:[#allocation9 + %s857_s18]]  ;;  %s865_s19 = sadd.s32 6, %s1872_s9  ;;  %v1035_v4 = vld [vmem:[#allocation16 + $0x248] sm:$0xff]  ;;  %v1009_v9 = vld [vmem:[#allocation16 + $0x178] sm:$0xff] }
 0x155   : > { %1045 = vmatpush.msra.mxu0 %v1022_v57  ;;  %1068 = vmatpush.msra.mxu1 %v1023_v7  ;;  %s1893_s20 = sld [smem:[#allocation9 + %s865_s19]]  ;;  %v1007_v5 = vld [vmem:[#allocation16 + $0x168] sm:$0xff]  ;;  %v1008_v8 = vld [vmem:[#allocation16 + $0x170] sm:$0xff]  ;;  %s873_s21 = sadd.s32 7, %s1872_s9  ;;  %v1030_v10 = vld [vmem:[#allocation16 + $0x220] sm:$0xff] }
 0x156   : > { %1091 = vmatpush.msra.mxu2 %v1024_v58  ;;  %1111 = vmatpush.msra.mxu3 %v1040_v2  ;;  %s1896_s4 = sld [smem:[#allocation9 + %s873_s21]]  ;;  %v1002_v11 = vld [vmem:[#allocation16 + $0x140] sm:$0xff]  ;;  %v1003_v14 = vld [vmem:[#allocation16 + $0x148] sm:$0xff]  ;;  %v1004_v15 = vld [vmem:[#allocation16 + $0x150] sm:$0xff]  ;;  %s881_s22 = sadd.s32 8, %s1872_s9 }
 0x157   : > { %1046 = vmatpush.msra.mxu0 %v1017_v59  ;;  %1069 = vmatpush.msra.mxu1 %v1018_v60  ;;  %v1025_v16 = vld [vmem:[#allocation16 + $0x1f8] sm:$0xff]  ;;  %v998_v17 = vld [vmem:[#allocation16 + $0x120] sm:$0xff]  ;;  %v999_v18 = vld [vmem:[#allocation16 + $0x128] sm:$0xff]  ;;  %s1899_s23 = sld [smem:[#allocation9 + %s881_s22]]  ;;  %s889_s24 = sadd.s32 9, %s1872_s9 }
 0x158   : > { %1092 = vmatpush.msra.mxu2 %v1019_v61  ;;  %1112 = vmatpush.msra.mxu3 %v1035_v4  ;;  %v997_v62 = vld [vmem:[#allocation16 + $0x118] sm:$0xff]  ;;  %v992_v19 = vld [vmem:[#allocation16 + $0xf0] sm:$0xff]  ;;  %v994_v22 = vld [vmem:[#allocation16 + $0x100] sm:$0xff]  ;;  %s1902_s25 = sld [smem:[#allocation9 + %s889_s24]]  ;;  %s897_s26 = sadd.s32 10, %s1872_s9 }
 0x159   : > { %1047 = vmatpush.msra.mxu0 %v1012_v0  ;;  %1070 = vmatpush.msra.mxu1 %v1013_v1  ;;  %v1020_v20 = vld [vmem:[#allocation16 + $0x1d0] sm:$0xff]  ;;  %v993_v21 = vld [vmem:[#allocation16 + $0xf8] sm:$0xff]  ;;  %v987_v23 = vld [vmem:[#allocation16 + $0xc8] sm:$0xff]  ;;  %s819_s27 = scalar_lea.vmem [#allocation5], %s1875_s10  ;;  %s1906_s1 = sld [smem:[#allocation9 + %s897_s26]] }
 0x15a   : > { %1093 = vmatpush.msra.mxu2 %v1014_v3  ;;  %1113 = vmatpush.msra.mxu3 %v1030_v10  ;;  %v988_v24 = vld [vmem:[#allocation16 + $0xd0] sm:$0xff]  ;;  %v989_v25 = vld [vmem:[#allocation16 + $0xd8] sm:$0xff]  ;;  %v1015_v28 = vld [vmem:[#allocation16 + $0x1a8] sm:$0xff]  ;;  %s827_s28 = scalar_lea.vmem [#allocation5], %s1878_s11  ;;  %s835_s29 = scalar_lea.vmem [#allocation5], %s1881_s13 }
 0x15b   : > { %1048 = vmatpush.msra.mxu0 %v1007_v5  ;;  %1071 = vmatpush.msra.mxu1 %v1008_v8  ;;  %v982_v29 = vld [vmem:[#allocation16 + $0xa0] sm:$0xff]  ;;  %v983_v30 = vld [vmem:[#allocation16 + $0xa8] sm:$0xff]  ;;  %v984_v13 = vld [vmem:[#allocation16 + $0xb0] sm:$0xff]  ;;  %s843_s3 = scalar_lea.vmem [#allocation5], %s1884_s15  ;;  %s851_s5 = scalar_lea.vmem [#allocation5], %s1887_s17 }
 0x15c   : > { %1094 = vmatpush.msra.mxu2 %v1009_v9  ;;  %1114 = vmatpush.msra.mxu3 %v1025_v16  ;;  %v1010_v63 = vld [vmem:[#allocation16 + $0x180] sm:$0xff]  ;;  %v820_v12 = vld [vmem:[%s819_s27] sm:$0x1]  ;;  %v977_v31 = vld [vmem:[#allocation16 + $0x78] sm:$0xff]  ;;  %s859_s0 = scalar_lea.vmem [#allocation5], %s1890_s2  ;;  %s867_s12 = scalar_lea.vmem [#allocation5], %s1893_s20 }
 0x15d   : > { %1049 = vmatpush.msra.mxu0 %v1002_v11  ;;  %1072 = vmatpush.msra.mxu1 %v1003_v14  ;;  %821 = vst [vmem:[#allocation6] sm:$0x1] %v820_v12  ;;  %v828_v26 = vld [vmem:[%s827_s28] sm:$0x1]  ;;  %v978_v32 = vld [vmem:[#allocation16 + $0x80] sm:$0xff]  ;;  %v1005_v41 = vld [vmem:[#allocation16 + $0x158] sm:$0xff] }
 0x15e   : > { %1095 = vmatpush.msra.mxu2 %v1004_v15  ;;  %1115 = vmatpush.msra.mxu3 %v1020_v20  ;;  %v836_v27 = vld [vmem:[%s835_s29] sm:$0x1]  ;;  %829 = vst [vmem:[#allocation6 + $0x1] sm:$0x1] %v828_v26  ;;  %v972_v36 = vld [vmem:[#allocation16 + $0x50] sm:$0xff]  ;;  %v973_v37 = vld [vmem:[#allocation16 + $0x58] sm:$0xff] }
 0x15f   : > { %1050 = vmatpush.msra.mxu0 %v997_v62  ;;  %1073 = vmatpush.msra.mxu1 %v998_v17  ;;  %v844_v33 = vld [vmem:[%s843_s3] sm:$0x1]  ;;  %837 = vst [vmem:[#allocation6 + $0x2] sm:$0x1] %v836_v27  ;;  %s905_s14 = sadd.s32 11, %s1872_s9  ;;  %v974_v39 = vld [vmem:[#allocation16 + $0x60] sm:$0xff] }
 0x160   : > { %1096 = vmatpush.msra.mxu2 %v999_v18  ;;  %1116 = vmatpush.msra.mxu3 %v1015_v28  ;;  %v852_v34 = vld [vmem:[%s851_s5] sm:$0x1]  ;;  %845 = vst [vmem:[#allocation6 + $0x3] sm:$0x1] %v844_v33  ;;  %s875_s16 = scalar_lea.vmem [#allocation5], %s1896_s4  ;;  %v1000_v54 = vld [vmem:[#allocation16 + $0x130] sm:$0xff] }
 0x161   : > { %1051 = vmatpush.msra.mxu0 %v992_v19  ;;  %1074 = vmatpush.msra.mxu1 %v993_v21  ;;  %v979_v40 = vld [vmem:[#allocation16 + $0x88] sm:$0xff]  ;;  %853 = vst [vmem:[#allocation6 + $0x4] sm:$0x1] %v852_v34  ;;  %v968_v43 = vld [vmem:[#allocation16 + $0x30] sm:$0xff]  ;;  %s913_s18 = sadd.s32 12, %s1872_s9  ;;  %s883_s19 = scalar_lea.vmem [#allocation5], %s1899_s23 }
 0x162   : > { %1097 = vmatpush.msra.mxu2 %v994_v22  ;;  %v860_v35 = vld [vmem:[%s859_s0] sm:$0x1]  ;;  %1117 = vmatpush.msra.mxu3 %v1010_v63  ;;  %s891_s21 = scalar_lea.vmem [#allocation5], %s1902_s25  ;;  %v969_v47 = vld [vmem:[#allocation16 + $0x38] sm:$0xff]  ;;  %v990_v48 = vld [vmem:[#allocation16 + $0xe0] sm:$0xff]  ;;  %s1919_s22 = sld [smem:[#allocation9 + %s905_s14]] }
 0x163   : > { %1052 = vmatpush.msra.mxu0 %v987_v23  ;;  %1075 = vmatpush.msra.mxu1 %v988_v24  ;;  %v868_v38 = vld [vmem:[%s867_s12] sm:$0x1]  ;;  %861 = vst [vmem:[#allocation6 + $0x5] sm:$0x1] %v860_v35  ;;  %s899_s24 = scalar_lea.vmem [#allocation5], %s1906_s1  ;;  %s1922_s26 = sld [smem:[#allocation9 + %s913_s18]] }
 0x164   : > { %1098 = vmatpush.msra.mxu2 %v989_v25  ;;  %v876_v42 = vld [vmem:[%s875_s16] sm:$0x1]  ;;  %1118 = vmatpush.msra.mxu3 %v1005_v41  ;;  %869 = vst [vmem:[#allocation6 + $0x6] sm:$0x1] %v868_v38  ;;  %s921_s27 = sadd.s32 13, %s1872_s9  ;;  %v962_v50 = vld [vmem:[#allocation16] sm:$0xff] }
 0x165   : > { %1053 = vmatpush.msra.mxu0 %v982_v29  ;;  %1076 = vmatpush.msra.mxu1 %v983_v30  ;;  %v967_v55 = vld [vmem:[#allocation16 + $0x28] sm:$0xff]  ;;  %877 = vst [vmem:[#allocation6 + $0x7] sm:$0x1] %v876_v42  ;;  %s1925_s28 = sld [smem:[#allocation9 + %s921_s27]]  ;;  %s929_s29 = sadd.s32 14, %s1872_s9  ;;  %v964_v52 = vld [vmem:[#allocation16 + $0x10] sm:$0xff] }
 0x166   : > { %1099 = vmatpush.msra.mxu2 %v984_v13  ;;  %v995_v44 = vld [vmem:[#allocation16 + $0x108] sm:$0xff]  ;;  %1119 = vmatpush.msra.mxu3 %v1000_v54  ;;  %v1041_v53 = vld [vmem:[#allocation16 + $0x278] sm:$0xff]  ;;  %s1928_s3 = sld [smem:[#allocation9 + %s929_s29]]  ;;  %s937_s5 = sadd.s32 15, %s1872_s9  ;;  %v1036_v56 = vld [vmem:[#allocation16 + $0x250] sm:$0xff] }
 0x167   : > { %1054 = vmatpush.msra.mxu0 %v977_v31  ;;  %1077 = vmatpush.msra.mxu1 %v978_v32  ;;  %v884_v45 = vld [vmem:[%s883_s19] sm:$0x1]  ;;  %v985_v6 = vld [vmem:[#allocation16 + $0xb8] sm:$0xff]  ;;  %s1931_s0 = sld [smem:[#allocation9 + %s937_s5]]  ;;  %v980_v58 = vld [vmem:[#allocation16 + $0x90] sm:$0xff]  ;;  %s822_s29 = scalar_lea.vmem [#allocation4], %s1875_s10 }
 0x168   : > { %v892_v46 = vld [vmem:[%s891_s21] sm:$0x1]  ;;  %1100 = vmatpush.msra.mxu2 %v979_v40  ;;  %885 = vst [vmem:[#allocation6 + $0x8] sm:$0x1] %v884_v45  ;;  %1120 = vmatpush.msra.mxu3 %v995_v44  ;;  %s907_s12 = scalar_lea.vmem [#allocation5], %s1919_s22  ;;  %v1026_v1 = vld [vmem:[#allocation16 + $0x200] sm:$0xff] }
 0x169   : > { %1055 = vmatpush.msra.mxu0 %v972_v36  ;;  %1078 = vmatpush.msra.mxu1 %v973_v37  ;;  %v900_v49 = vld [vmem:[%s899_s24] sm:$0x1]  ;;  %893 = vst [vmem:[#allocation6 + $0x9] sm:$0x1] %v892_v46  ;;  %s915_s14 = scalar_lea.vmem [#allocation5], %s1922_s26  ;;  %v970_v4 = vld [vmem:[#allocation16 + $0x40] sm:$0xff] }
 0x16a   : > { %1101 = vmatpush.msra.mxu2 %v974_v39  ;;  %v963_v51 = vld [vmem:[#allocation16 + $0x8] sm:$0xff]  ;;  %901 = vst [vmem:[#allocation6 + $0xa] sm:$0x1] %v900_v49  ;;  %1121 = vmatpush.msra.mxu3 %v990_v48  ;;  %v1021_v5 = vld [vmem:[#allocation16 + $0x1d8] sm:$0xff]  ;;  %v1016_v9 = vld [vmem:[#allocation16 + $0x1b0] sm:$0xff]  ;;  %s945_s21 = sshra.s32 %s1872_s9, 3 }
 0x16b   : > { %1056 = vmatpush.msra.mxu0 %v967_v55  ;;  %1079 = vmatpush.msra.mxu1 %v968_v43  ;;  %v908_v7 = vld [vmem:[%s907_s12] sm:$0x1]  ;;  %s923_s16 = scalar_lea.vmem [#allocation5], %s1925_s28  ;;  %v965_v8 = vld [vmem:[#allocation16 + $0x18] sm:$0xff]  ;;  %v1006_v11 = vld [vmem:[#allocation16 + $0x160] sm:$0xff]  ;;  %s1431_s24 = smul.u32 40, %s945_s21 }
 0x16c   : > { %1102 = vmatpush.msra.mxu2 %v969_v47  ;;  %v1933_v57 = vld [vmem:[#allocation6] sm:$0xff]  ;;  %1122 = vmatpush.msra.mxu3 %v985_v6  ;;  %v1031_v59 = vld [vmem:[#allocation16 + $0x228] sm:$0xff]  ;;  %909 = vst [vmem:[#allocation6 + $0xb] sm:$0x1] %v908_v7  ;;  %s931_s18 = scalar_lea.vmem [#allocation5], %s1928_s3  ;;  %v996_v16 = vld [vmem:[#allocation16 + $0x110] sm:$0xff] }
 0x16d   : > { %1057 = vmatpush.msra.mxu0 %v962_v50  ;;  %1080 = vmatpush.msra.mxu1 %v963_v51  ;;  %v916_v60 = vld [vmem:[%s915_s14] sm:$0x1]  ;;  %s939_s19 = scalar_lea.vmem [#allocation5], %s1931_s0  ;;  %v1001_v15 = vld [vmem:[#allocation16 + $0x138] sm:$0xff]  ;;  %v986_v17 = vld [vmem:[#allocation16 + $0xc0] sm:$0xff]  ;;  %s1946_s27 = scalar_lea.vmem [#allocation2], %s1431_s24 }
 0x16e   : > { %1103 = vmatpush.msra.mxu2 %v964_v52  ;;  %1058 = vmatmul.f32.vlgmr.msra.gmra.mxu0 %v1933_v57  ;;  %917 = vst [vmem:[#allocation6 + $0xc] sm:$0x1] %v916_v60  ;;  %v924_v61 = vld [vmem:[%s923_s16] sm:$0x1]  ;;  %v981_v18 = vld [vmem:[#allocation16 + $0x98] sm:$0xff]  ;;  %v976_v19 = vld [vmem:[#allocation16 + $0x70] sm:$0xff] }
 0x16f   : > { %1134 = vmatpush.msrb.mxu0 %v1041_v53  ;;  %1432 = vmatpush.msrb.mxu1 %v1041_v53  ;;  %v975_v0 = vld [vmem:[#allocation16 + $0x68] sm:$0xff]  ;;  %925 = vst [vmem:[#allocation6 + $0xd] sm:$0x1] %v924_v61  ;;  %v966_v21 = vld [vmem:[#allocation16 + $0x20] sm:$0xff]  ;;  %s830_s5 = scalar_lea.vmem [#allocation4], %s1878_s11  ;;  %s838_s12 = scalar_lea.vmem [#allocation4], %s1881_s13 }
 0x170   : > { %1104 = vmatmul.f32.vlgmr.msra.gmra.mxu2 %v1933_v57  ;;  %1081 = vmatmul.f32.vlgmr.msra.gmra.mxu1 %v1933_v57  ;;  %v932_v2 = vld [vmem:[%s931_s18] sm:$0x1]  ;;  %s846_s14 = scalar_lea.vmem [#allocation4], %s1884_s15  ;;  %s854_s16 = scalar_lea.vmem [#allocation4], %s1887_s17  ;;  %v952_v26 = vld [vmem:[%s1946_s27 + $0x10] sm:$0xff]  ;;  %v951_v40 = vld [vmem:[%s1946_s27 + $0x8] sm:$0xff] }
 0x171   : > { %1135 = vmatpush.msrb.mxu0 %v1036_v56  ;;  %1433 = vmatpush.msrb.mxu1 %v1036_v56  ;;  %933 = vst [vmem:[#allocation6 + $0xe] sm:$0x1] %v932_v2  ;;  %v940_v3 = vld [vmem:[%s939_s19] sm:$0x1]  ;;  %s862_s10 = scalar_lea.vmem [#allocation4], %s1890_s2  ;;  %s870_s11 = scalar_lea.vmem [#allocation4], %s1893_s20 }
 0x172   : > { %1123 = vmatpush.msra.mxu3 %v980_v58  ;;  %941 = vst [vmem:[#allocation6 + $0xf] sm:$0x1] %v940_v3  ;;  %v1011_v10 = vld [vmem:[#allocation16 + $0x188] sm:$0xff]  ;;  %s878_s13 = scalar_lea.vmem [#allocation4], %s1896_s4  ;;  %v955_v41 = vld [vmem:[%s1946_s27 + $0x28] sm:$0xff]  ;;  %v956_v36 = vld [vmem:[%s1946_s27 + $0x30] sm:$0xff] }
 0x173   : > { %1136 = vmatpush.msrb.mxu0 %v1031_v59  ;;  %1434 = vmatpush.msrb.mxu1 %v1031_v59  ;;  %v991_v62 = vld [vmem:[#allocation16 + $0xe8] sm:$0xff]  ;;  %s886_s15 = scalar_lea.vmem [#allocation4], %s1899_s23  ;;  %s894_s17 = scalar_lea.vmem [#allocation4], %s1902_s25 }
 0x174   : > { %1124 = vmatpush.msra.mxu3 %v975_v0  ;;  %v971_v20 = vld [vmem:[#allocation16 + $0x48] sm:$0xff]  ;;  %s902_s2 = scalar_lea.vmem [#allocation4], %s1906_s1  ;;  %s910_s20 = scalar_lea.vmem [#allocation4], %s1919_s22 }
 0x175   : > { %1137 = vmatpush.msrb.mxu0 %v1026_v1  ;;  %1435 = vmatpush.msrb.mxu1 %v1026_v1  ;;  %v950_v22 = vld [vmem:[%s1946_s27] sm:$0xff]  ;;  %s918_s4 = scalar_lea.vmem [#allocation4], %s1922_s26  ;;  %s926_s23 = scalar_lea.vmem [#allocation4], %s1925_s28  ;;  %v957_v6 = vld [vmem:[%s1946_s27 + $0x38] sm:$0xff] }
 0x176   : > { %1125 = vmatpush.msra.mxu3 %v970_v4  ;;  %v823_v25 = vld [vmem:[%s822_s29] sm:$0x1]  ;;  %s934_s25 = scalar_lea.vmem [#allocation4], %s1928_s3  ;;  %s942_s1 = scalar_lea.vmem [#allocation4], %s1931_s0  ;;  %v953_v1 = vld [vmem:[%s1946_s27 + $0x18] sm:$0xff] }
 0x177   : > { %1138 = vmatpush.msrb.mxu0 %v1021_v5  ;;  %1436 = vmatpush.msrb.mxu1 %v1021_v5  ;;  %v831_v28 = vld [vmem:[%s830_s5] sm:$0x1]  ;;  %824 = vst [vmem:[#allocation7] sm:$0x1] %v823_v25  ;;  %s1344_s22 = scalar_lea.vmem [#allocation4], %s1872_s9  ;;  %s1337_s26 = scalar_lea.vmem [#allocation3], %s1872_s9 }
 0x178   : > { %1126 = vmatpush.msra.mxu3 %v965_v8  ;;  %v839_v29 = vld [vmem:[%s838_s12] sm:$0x1]  ;;  %832 = vst [vmem:[#allocation7 + $0x1] sm:$0x1] %v831_v28  ;;  %s1347_s28 = scalar_lea.vmem [#allocation5], %s1872_s9  ;;  %s1350_s3 = scalar_lea.vmem [#allocation19], %s1872_s9 }
 0x179   : > { %1139 = vmatpush.msrb.mxu0 %v1016_v9  ;;  %1127 = vmatmul.f32.vlgmr.msra.gmra.mxu3 %v1933_v57  ;;  %v961_v14 = vld [vmem:[#allocation6 + $0x8] sm:$0xff]  ;;  %v847_v30 = vld [vmem:[%s846_s14] sm:$0x1]  ;;  %840 = vst [vmem:[#allocation7 + $0x2] sm:$0x1] %v839_v29  ;;  %p813_p0 = scmp.ge.s32.totalorder %s816_s6, 3  }
 0x17a   : > { %1437 = vmatpush.msrb.mxu1 %v1016_v9  ;;  %1061 = vmatmul.f32.gmra.mxu0 %v961_v14  ;;  %v855_v13 = vld [vmem:[%s854_s16] sm:$0x1]  ;;  %848 = vst [vmem:[#allocation7 + $0x3] sm:$0x1] %v847_v30  ;;  %s1359_s19 = sshll.u32 (%p813_p0), %s2104_s7, 4  ;;  %s1698_s21 = smov (%p813_p0), [#allocation19]   ;;  %s1360_s19 = int_to_ptr.hbm [resolvable:$true] %s1359_s19 }
 0x17b   : > { %1140 = vmatpush.msrb.mxu0 %v1011_v10  ;;  %1107 = vmatmul.f32.gmra.mxu2 %v961_v14  ;;  %v863_v27 = vld [vmem:[%s862_s10] sm:$0x1]  ;;  %856 = vst [vmem:[#allocation7 + $0x4] sm:$0x1] %v855_v13  ;;  %s1357_s24 = sshll.u32 (%p813_p0), %s1698_s21, 4  ;;  %s1358_s24 = int_to_ptr.vmem [resolvable:$true] %s1357_s24 }
 0x17c   : > { %1084 = vmatmul.f32.gmra.mxu1 %v961_v14  ;;  %v871_v31 = vld [vmem:[%s870_s11] sm:$0x1]  ;;  %864 = vst [vmem:[#allocation7 + $0x5] sm:$0x1] %v863_v27 }
 0x17d   : > { %1141 = vmatpush.msrb.mxu0 %v1006_v11  ;;  %1438 = vmatpush.msrb.mxu1 %v1011_v10  ;;  %v879_v33 = vld [vmem:[%s878_s13] sm:$0x1]  ;;  %872 = vst [vmem:[#allocation7 + $0x6] sm:$0x1] %v871_v31 }
 0x17e   : > { %880 = vst [vmem:[#allocation7 + $0x7] sm:$0x1] %v879_v33  ;;  %v887_v37 = vld [vmem:[%s886_s15] sm:$0x1] }
 0x17f   : > { %1142 = vmatpush.msrb.mxu0 %v1001_v15  ;;  %1439 = vmatpush.msrb.mxu1 %v1006_v11  ;;  %888 = vst [vmem:[#allocation7 + $0x8] sm:$0x1] %v887_v37  ;;  %v895_v38 = vld [vmem:[%s894_s17] sm:$0x1]  ;;  %v959_v37 = vld [vmem:[%s1946_s27 + $0x48] sm:$0xff] }
 0x180   : > { %v903_v39 = vld [vmem:[%s902_s2] sm:$0x1]  ;;  %896 = vst [vmem:[#allocation7 + $0x9] sm:$0x1] %v895_v38 }
 0x181   : > { %1143 = vmatpush.msrb.mxu0 %v996_v16  ;;  %1130 = vmatmul.f32.gmra.mxu3 %v961_v14  ;;  %v911_v55 = vld [vmem:[%s910_s20] sm:$0x1]  ;;  %904 = vst [vmem:[#allocation7 + $0xa] sm:$0x1] %v903_v39 }
 0x182   : > { %1440 = vmatpush.msrb.mxu1 %v1001_v15  ;;  %v919_v43 = vld [vmem:[%s918_s4] sm:$0x1]  ;;  %912 = vst [vmem:[#allocation7 + $0xb] sm:$0x1] %v911_v55 }
 0x183   : > { %1144 = vmatpush.msrb.mxu0 %v991_v62  ;;  %v927_v46 = vld [vmem:[%s926_s23] sm:$0x1]  ;;  %920 = vst [vmem:[#allocation7 + $0xc] sm:$0x1] %v919_v43 }
 0x184   : > { %1441 = vmatpush.msrb.mxu1 %v996_v16  ;;  %v935_v50 = vld [vmem:[%s934_s25] sm:$0x1]  ;;  %928 = vst [vmem:[#allocation7 + $0xd] sm:$0x1] %v927_v46 }
 0x185   : > { %1145 = vmatpush.msrb.mxu0 %v986_v17  ;;  %v943_v52 = vld [vmem:[%s942_s1] sm:$0x1]  ;;  %936 = vst [vmem:[#allocation7 + $0xe] sm:$0x1] %v935_v50 }
 0x186   : > { %1442 = vmatpush.msrb.mxu1 %v991_v62  ;;  %944 = vst [vmem:[#allocation7 + $0xf] sm:$0x1] %v943_v52  ;;  %v954_v29 = vld [vmem:[%s1946_s27 + $0x20] sm:$0xff] }
 0x187   : > { %1146 = vmatpush.msrb.mxu0 %v981_v18 }
 0x188   : > { %1443 = vmatpush.msrb.mxu1 %v986_v17 }
 0x189   : > { %1147 = vmatpush.msrb.mxu0 %v976_v19 }
 0x18a   : > { %1444 = vmatpush.msrb.mxu1 %v981_v18 }
 0x18b   : > { %1148 = vmatpush.msrb.mxu0 %v971_v20 }
 0x18c   : > { %1445 = vmatpush.msrb.mxu1 %v976_v19 }
 0x18d   : > { %1149 = vmatpush.msrb.mxu0 %v966_v21 }
 0x18e   : > { %1446 = vmatpush.msrb.mxu1 %v971_v20  ;;  %1150 = vmatmul.f32.vlgmr.msrb.gmra.mxu0 %v1933_v57 }
 0x190   : > { %1447 = vmatpush.msrb.mxu1 %v966_v21 }
 0x191   : > { %1153 = vmatmul.f32.vlgmr.msrb.gmra.mxu1 %v961_v14 }
 0x1eb   : > { %v1059_v23 = vpop.f32.mrf.mxu0 }
 0x1ec   : > { %v1157_v24 = vadd.f32 %v1059_v23, %v950_v22 }
 0x1ed   : > { %v1082_v12 = vpop.f32.mrf.mxu1 }
 0x1ee   : > { %v1423_v63 = vmul.f32 -1.442695, %v1157_v24  ;;  %v1158_v54 = vadd.f32 %v1082_v12, %v951_v40 }
 0x1f0   : > { %1471 = vpow2.f32 %v1423_v63  ;;  %v1425_v51 = vmul.f32 -1.442695, %v1158_v54 }
 0x1f3   : > { %v1105_v32 = vpop.f32.mrf.mxu2 }
 0x1f4   : > { %v1159_v34 = vadd.f32 %v1105_v32, %v952_v26  ;;  %v958_v26 = vld [vmem:[%s1946_s27 + $0x40] sm:$0xff] }
 0x1f6   : > { %v1427_v35 = vmul.f32 -1.442695, %v1159_v34  ;;  %v1472_v42 = vpop.eup %1471 }
 0x1f7   : > { %v1173_v44 = vadd.f32 1.0, %v1472_v42  ;;  %v1062_v45 = vpop.f32.mrf.mxu0 }
 0x1f8   : > { %1473 = vpow2.f32 %v1427_v35  ;;  %v1162_v47 = vadd.f32 %v1062_v45, %v955_v41 }
 0x1f9   : > { %v1085_v48 = vpop.f32.mrf.mxu1  ;;  %1475 = vrcp.f32 %v1173_v44  ;;  %vm1180_vm0 = vweird.f32 %v1173_v44  ;;  %v1184_v8 = vand.u32 2147483647, %v1173_v44  ;;  %v1186_v14 = vand.u32 2147483648, %v1173_v44 }
 0x1fa   : > { %v1163_v49 = vadd.f32 %v1085_v48, %v956_v36  ;;  %v1424_v53 = vmul.f32 -1.442695, %v1162_v47  ;;  %v1323_v36 = vld [vmem:[#allocation7] sm:$0xff] }
 0x1fb   : > { %vm1984_vm3 = vcmp.eq.f32.partialorder %v1184_v8, 8.507059e+37  ;;  %v1187_v23 = vor.u32 1.1754944e-38, %v1186_v14 }
 0x1fc   : > { %1477 = vpow2.f32 %v1424_v53  ;;  %v1426_v7 = vmul.f32 -1.442695, %v1163_v49  ;;  %v1128_v2 = vpop.f32.mrf.mxu3 }
 0x1fd   : > { %1479 = vpow2.f32 %v1425_v51  ;;  %v1160_v5 = vadd.f32 %v1128_v2, %v953_v1 }
 0x1fe   : > { %v1474_v56 = vpop.eup %1473  ;;  %v1108_v58 = vpop.f32.mrf.mxu2 }
 0x1ff   : > { %v1970_v57 = vadd.f32 1.0, %v1474_v56  ;;  %v1164_v59 = vadd.f32 %v1108_v58, %v957_v6  ;;  %v1476_v60 = vpop.eup %1475 }
 0x200   : > { %v1176_v61 = vmul.f32 %v1476_v60, %v1173_v44  ;;  %vm1181_vm1 = vweird.f32 %v1476_v60 }
 0x201   : > { %1481 = vrcp.f32 %v1970_v57  ;;  %v1428_v0 = vmul.f32 -1.442695, %v1164_v59  ;;  %vm1978_vm2 = vmor %vm1180_vm0, %vm1181_vm1  ;;  %vm1256_vm4 = vweird.f32 %v1970_v57  ;;  %v1262_v24 = vand.u32 2147483648, %v1970_v57 }
 0x202   : > { %1483 = vpow2.f32 %v1426_v7  ;;  %v1177_v3 = vsub.f32 1.0, %v1176_v61  ;;  %v1478_v4 = vpop.eup %1477  ;;  %v1260_v28 = vand.u32 2147483647, %v1970_v57 }
 0x203   : > { %1485 = vpow2.f32 %v1428_v0  ;;  %v1480_v9 = vpop.eup %1479  ;;  %v1974_v10 = vadd.f32 1.0, %v1478_v4  ;;  %v1263_v40 = vor.u32 1.1754944e-38, %v1262_v24 }
 0x204   : > { %v1178_v11 = vmul.f32 %v1476_v60, %v1177_v3  ;;  %v1982_v20 = vadd.f32 1.0, %v1480_v9  ;;  %v1131_v27 = vpop.f32.mrf.mxu3  ;;  %vm1261_vm7 = vcmp.eq.f32.partialorder %v1260_v28, 8.507059e+37 }
 0x205   : > { %1487 = vrcp.f32 %v1974_v10  ;;  %v1165_v42 = vadd.f32 %v1131_v27, %v958_v26  ;;  %vm1195_vm8 = vweird.f32 %v1974_v10  ;;  %v1201_v49 = vand.u32 2147483648, %v1974_v10 }
 0x206   : > { %v1179_v62 = vadd.f32 %v1476_v60, %v1178_v11  ;;  %1489 = vtanh.f32 %v1160_v5  ;;  %v1199_v52 = vand.u32 2147483647, %v1974_v10  ;;  %v1324_v11 = vld [vmem:[#allocation7 + $0x8] sm:$0xff]  ;;  %vm1218_vm0 = vweird.f32 %v1982_v20 }
 0x207   : > { %v1482_v15 = vpop.eup %1481  ;;  %v1222_v28 = vand.u32 2147483647, %v1982_v20 }
 0x208   : > { %v1252_v16 = vmul.f32 %v1482_v15, %v1970_v57  ;;  %v1484_v17 = vpop.eup %1483  ;;  %vm1257_vm5 = vweird.f32 %v1482_v15  ;;  %v1183_v13 = vsel %vm1978_vm2, %v1476_v60, %v1179_v62  ;;  %v1202_v60 = vor.u32 1.1754944e-38, %v1201_v49 }
 0x209   : > { %v1486_v19 = vpop.eup %1485  ;;  %v1994_v12 = vadd.f32 1.0, %v1484_v17  ;;  %vm1258_vm6 = vmor %vm1256_vm4, %vm1257_vm5  ;;  %v1188_v35 = vsel %vm1984_vm3, %v1187_v23, %v1183_v13  ;;  %vm1200_vm13 = vcmp.eq.f32.partialorder %v1199_v52, 8.507059e+37  ;;  %vm2055_vm5 = vcmp.eq.f32.partialorder %v1222_v28, 8.507059e+37  ;;  %v1338_v52 = vld [vmem:[%s1337_s26] sm:$0xff] }
 0x20a   : > { %v1253_v21 = vsub.f32 1.0, %v1252_v16  ;;  %v1990_v25 = vadd.f32 1.0, %v1486_v19 }
 0x20b   : > { %v1151_v30 = vpop.f32.mrf.mxu0  ;;  %v1488_v31 = vpop.eup %1487  ;;  %vm1233_vm2 = vweird.f32 %v1994_v12 }
 0x20c   : > { %v1254_v63 = vmul.f32 %v1482_v15, %v1253_v21  ;;  %1491 = vrcp.f32 %v1990_v25  ;;  %v1161_v33 = vadd.f32 %v1151_v30, %v954_v29  ;;  %v1490_v34 = vpop.eup %1489  ;;  %v1191_v41 = vmul.f32 %v1488_v31, %v1974_v10 }
 0x20d   : > { %1493 = vrcp.f32 %v1982_v20  ;;  %v1321_v44 = vmul.f32 %v1490_v34, %v1188_v35  ;;  %vm1196_vm9 = vweird.f32 %v1488_v31  ;;  %vm1271_vm11 = vweird.f32 %v1990_v25 }
 0x20e   : > { %v1255_v32 = vadd.f32 %v1482_v15, %v1254_v63  ;;  %v1154_v38 = vpop.f32.mrf.mxu1  ;;  %1495 = vrcp.f32 %v1994_v12  ;;  %v1192_v54 = vsub.f32 1.0, %v1191_v41  ;;  %v1429_v43 = vmul.f32 -1.442695, %v1161_v33  ;;  %vm2016_vm10 = vmor %vm1195_vm8, %vm1196_vm9 }
 0x20f   : > { %v1166_v46 = vadd.f32 %v1154_v38, %v959_v37  ;;  %v1277_v59 = vand.u32 2147483648, %v1990_v25  ;;  %v1275_v61 = vand.u32 2147483647, %v1990_v25  ;;  %v1224_v30 = vand.u32 2147483648, %v1982_v20 }
 0x210   : > { %v1259_v39 = vsel %vm1258_vm6, %v1482_v15, %v1255_v32  ;;  %v1193_v48 = vmul.f32 %v1488_v31, %v1192_v54  ;;  %1497 = vpow2.f32 %v1429_v43  ;;  %v1237_v32 = vand.u32 2147483647, %v1994_v12 }
 0x211   : > { %v1264_v55 = vsel %vm1261_vm7, %v1263_v40, %v1259_v39  ;;  %1499 = vtanh.f32 %v1165_v42  ;;  %v1430_v57 = vmul.f32 -1.442695, %v1166_v46  ;;  %v1278_v9 = vor.u32 1.1754944e-38, %v1277_v59 }
 0x212   : > { %v1325_v45 = vmul.f32 %v1323_v36, %v1264_v55  ;;  %v1492_v47 = vpop.eup %1491  ;;  %v1194_v6 = vadd.f32 %v1488_v31, %v1193_v48  ;;  %vm1276_vm15 = vcmp.eq.f32.partialorder %v1275_v61, 8.507059e+37  ;;  %v1225_v35 = vor.u32 1.1754944e-38, %v1224_v30 }
 0x213   : > { %v1267_v50 = vmul.f32 %v1492_v47, %v1990_v25  ;;  %v2012_v53 = vpop.eup %1493  ;;  %1501 = vpow2.f32 %v1430_v57  ;;  %vm1272_vm12 = vweird.f32 %v1492_v47  ;;  %v1239_v37 = vand.u32 2147483648, %v1994_v12 }
 0x214   : > { %v1327_v51 = vadd.f32 %v1325_v45, %v1321_v44  ;;  %v2020_v7 = vpop.eup %1495  ;;  %v1198_v1 = vsel %vm2016_vm10, %v1488_v31, %v1194_v6  ;;  %v1214_v3 = vmul.f32 %v2012_v53, %v1982_v20  ;;  %vm1273_vm14 = vmor %vm1271_vm11, %vm1272_vm12  ;;  %vm1219_vm1 = vweird.f32 %v2012_v53 }
 0x215   : > { %v1268_v58 = vsub.f32 1.0, %v1267_v50  ;;  %v1203_v10 = vsel %vm1200_vm13, %v1202_v60, %v1198_v1  ;;  %v1229_v14 = vmul.f32 %v2020_v7, %v1994_v12  ;;  %vm2049_vm3 = vmor %vm1218_vm0, %vm1219_vm1  ;;  %vm1234_vm4 = vweird.f32 %v2020_v7  ;;  %v1339_v1 = vld [vmem:[%s1337_s26 + $0x8] sm:$0xff] }
 0x216   : > { %1345 = vst [vmem:[%s1344_s22] sm:$0xff] %v1327_v51  ;;  %v1498_v2 = vpop.eup %1497  ;;  %v1215_v62 = vsub.f32 1.0, %v1214_v3  ;;  %vm2067_vm7 = vmor %vm1233_vm2, %vm1234_vm4  ;;  %vm2071_vm9 = vcmp.eq.f32.partialorder %v1237_v32, 8.507059e+37  ;;  %v1240_v50 = vor.u32 1.1754944e-38, %v1239_v37 }
 0x217   : > { %v1269_v0 = vmul.f32 %v1492_v47, %v1268_v58  ;;  %v1289_v5 = vadd.f32 1.0, %v1498_v2  ;;  %v1500_v8 = vpop.eup %1499  ;;  %v1230_v22 = vsub.f32 1.0, %v1229_v14 }
 0x218   : > { %v1322_v18 = vmul.f32 %v1500_v8, %v1203_v10  ;;  %v1216_v24 = vmul.f32 %v2012_v53, %v1215_v62 }
 0x219   : > { %v1270_v4 = vadd.f32 %v1492_v47, %v1269_v0  ;;  %1503 = vrcp.f32 %v1289_v5  ;;  %v1502_v16 = vpop.eup %1501  ;;  %v1231_v63 = vmul.f32 %v2020_v7, %v1230_v22  ;;  %v1300_v33 = vand.u32 2147483647, %v1289_v5 }
 0x21a   : > { %v2036_v21 = vadd.f32 1.0, %v1502_v16  ;;  %v1217_v13 = vadd.f32 %v2012_v53, %v1216_v24  ;;  %v1302_v34 = vand.u32 2147483648, %v1289_v5  ;;  %vm1296_vm8 = vweird.f32 %v1289_v5 }
 0x21b   : > { %v1274_v15 = vsel %vm1273_vm14, %v1492_v47, %v1270_v4  ;;  %v1232_v36 = vadd.f32 %v2020_v7, %v1231_v63  ;;  %vm1301_vm11 = vcmp.eq.f32.partialorder %v1300_v33, 8.507059e+37 }
 0x21c   : > { %v1279_v17 = vsel %vm1276_vm15, %v1278_v9, %v1274_v15  ;;  %1505 = vrcp.f32 %v2036_v21  ;;  %v1221_v38 = vsel %vm2049_vm3, %v2012_v53, %v1217_v13  ;;  %v1303_v44 = vor.u32 1.1754944e-38, %v1302_v34 }
 0x21d   : > { %v1326_v19 = vmul.f32 %v1324_v11, %v1279_v17  ;;  %1507 = vtanh.f32 %v1327_v51  ;;  %v1317_v45 = vand.u32 2147483648, %v2036_v21  ;;  %v1315_v47 = vand.u32 2147483647, %v2036_v21 }
 0x21e   : > { %v1226_v48 = vsel %vm2055_vm5, %v1225_v35, %v1221_v38  ;;  %v1236_v49 = vsel %vm2067_vm7, %v2020_v7, %v1232_v36  ;;  %vm1311_vm13 = vweird.f32 %v2036_v21 }
 0x21f   : > { %v1328_v23 = vadd.f32 %v1326_v19, %v1322_v18  ;;  %v1504_v25 = vpop.eup %1503  ;;  %v1318_v58 = vor.u32 1.1754944e-38, %v1317_v45  ;;  %vm1316_vm15 = vcmp.eq.f32.partialorder %v1315_v47, 8.507059e+37  ;;  %v1241_v7 = vsel %vm2071_vm9, %v1240_v50, %v1236_v49 }
 0x220   : > { %v1292_v29 = vmul.f32 %v1504_v25, %v1289_v5  ;;  %vm1297_vm6 = vweird.f32 %v1504_v25 }
 0x221   : > { %1346 = vst [vmem:[%s1344_s22 + $0x8] sm:$0xff] %v1328_v23  ;;  %1509 = vtanh.f32 %v1328_v23  ;;  %vm1298_vm10 = vmor %vm1296_vm8, %vm1297_vm6 }
 0x222   : > { %v1293_v26 = vsub.f32 1.0, %v1292_v29  ;;  %v1506_v27 = vpop.eup %1505 }
 0x223   : > { %v1307_v41 = vmul.f32 %v1506_v27, %v2036_v21  ;;  %v1508_v55 = vpop.eup %1507  ;;  %vm1312_vm12 = vweird.f32 %v1506_v27 }
 0x224   : > { %v1294_v40 = vmul.f32 %v1504_v25, %v1293_v26  ;;  %v1331_v53 = vmul.f32 %v1508_v55, %v1226_v48  ;;  %vm1313_vm14 = vmor %vm1311_vm13, %vm1312_vm12 }
 0x225   : > { %v1308_v54 = vsub.f32 1.0, %v1307_v41 }
 0x226   : > { %v1295_v42 = vadd.f32 %v1504_v25, %v1294_v40 }
 0x227   : > { %v1309_v12 = vmul.f32 %v1506_v27, %v1308_v54  ;;  %v1510_v57 = vpop.eup %1509 }
 0x228   : > { %v1299_v46 = vsel %vm1298_vm10, %v1504_v25, %v1295_v42  ;;  %v1332_v2 = vmul.f32 %v1510_v57, %v1241_v7 }
 0x229   : > { %v1304_v51 = vsel %vm1301_vm11, %v1303_v44, %v1299_v46  ;;  %v1310_v56 = vadd.f32 %v1506_v27, %v1309_v12 }
 0x22a   : > { %v1335_v6 = vsub.f32 1.0, %v1304_v51  ;;  %v1333_v59 = vmul.f32 %v1331_v53, %v1304_v51 }
 0x22b   : > { %v1314_v61 = vsel %vm1313_vm14, %v1506_v27, %v1310_v56 }
 0x22c   : > { %v1340_v60 = vmul.f32 %v1338_v52, %v1335_v6  ;;  %v1319_v0 = vsel %vm1316_vm15, %v1318_v58, %v1314_v61 }
 0x22d   : > { %v1336_v4 = vsub.f32 1.0, %v1319_v0  ;;  %v1334_v5 = vmul.f32 %v1332_v2, %v1319_v0 }
 0x22e   : > { %v1342_v3 = vadd.f32 %v1340_v60, %v1333_v59 }
 0x22f   : > { %v1341_v8 = vmul.f32 %v1339_v1, %v1336_v4 }
 0x230   : > { %1348 = vst [vmem:[%s1347_s28] sm:$0xff] %v1342_v3  ;;  %815 = sbr.rel (!%p813_p0) target bundleno = 334 (0x14e), region = 108 }
 0x231   : > { %1351 = vst [vmem:[%s1350_s3] sm:$0xff] %v1342_v3  ;;  %v1343_v9 = vadd.f32 %v1341_v8, %v1334_v5 }
 0x233   : > { %1349 = vst [vmem:[%s1347_s28 + $0x8] sm:$0xff] %v1343_v9 }
 0x234   : > { %1352 = vst [vmem:[%s1350_s3 + $0x8] sm:$0xff] %v1343_v9 }
 0x235   :  { %1365 = dma.vmem_to_hbm [thread:$0]  %s1358_s24, 768, %s1360_s19, [#allocation12], %s1695_s30, %s1695_s30, %s1696_s8  }
 0x236   :  { %1679 = dma.done.wait [#allocation12], 768  }
 0x237   :  { %1680 = vsyncadd [#allocation12], 4294966528 }
 0x238   :  { %1370 = vsyncpa [#allocation11], 1 }
 0x239   :  { %1371 = vsyncpa [#allocation14], 1 }
 0x23a   :  { %1372 = vsyncpa [#allocation17], 1 }
 0x23b   :  { %1373 = vsyncpa [#allocation12], 1 }

</bundles_post_ra>
